<compile_context>
chip_gen: v5e
topology: v5e:2x2
jax: 0.10.0
libtpu: 0.0.40
codegen_flags: <defaults>
</compile_context>

<pallas_src>
import jax
import jax.numpy as jnp
from jax.experimental import pallas as pl
from jax.experimental.pallas import tpu as pltpu

I_DIM = 10   # module default i_dim
HID = 10     # module hard-codes LSTM hidden_size=10


def _pose_lstm_kernel(x_ref, h0_ref, c0_ref,
                      wxg_ref, bg_ref, whg_ref,
                      wout_ref, bout_ref,
                      y_ref, hn_ref, cn_ref,
                      h_all):
    """Single-shot kernel: whole sequence in VMEM, unrolled time loop.

    x_ref   : (T*B, I)       time-major, flattened
    h0/c0   : (B, HID)
    wxg_ref : (4, I, HID)    fused (w_ih @ w_in), per-gate, pre-transposed
    bg_ref  : (4, 1, HID)    fused bias (w_ih@b_in + b_ih + b_hh), per-gate
    whg_ref : (4, HID, HID)  w_hh, per-gate, pre-transposed
    wout_ref: (HID, I)       w_out pre-transposed
    bout_ref: (1, I)
    y_ref   : (T*B, I)
    hn/cn   : (B, HID)
    h_all   : VMEM scratch (T*B, HID) — hidden states for the hoisted out-proj
    """
    B = h0_ref.shape[0]
    TB = x_ref.shape[0]
    T = TB // B

    # ---- hoisted, fused input projection: one bulk matmul per gate ----------
    x = x_ref[...]                                              # (T*B, I)
    gin = [jnp.dot(x, wxg_ref[g], preferred_element_type=jnp.float32) + bg_ref[g]
           for g in range(4)]                                   # 4 x (T*B, HID)

    # recurrent weights loaded once (no per-step transposes / slices)
    whh = [whg_ref[g] for g in range(4)]                        # 4 x (HID, HID)

    # ---- recurrence: h/c carried in registers, loop fully unrolled ----------
    h = h0_ref[...]                                             # (B, HID)
    c = c0_ref[...]                                             # (B, HID)

    for t in range(T):                                          # static unroll
        lo = t * B
        g_i = gin[0][lo:lo + B, :] + jnp.dot(h, whh[0], preferred_element_type=jnp.float32)
        g_f = gin[1][lo:lo + B, :] + jnp.dot(h, whh[1], preferred_element_type=jnp.float32)
        g_g = gin[2][lo:lo + B, :] + jnp.dot(h, whh[2], preferred_element_type=jnp.float32)
        g_o = gin[3][lo:lo + B, :] + jnp.dot(h, whh[3], preferred_element_type=jnp.float32)

        c = jax.nn.sigmoid(g_f) * c + jax.nn.sigmoid(g_i) * jnp.tanh(g_g)
        h = jax.nn.sigmoid(g_o) * jnp.tanh(c)

        h_all[pl.ds(lo, B), :] = h                              # cheap VMEM store

    hn_ref[...] = h
    cn_ref[...] = c

    # ---- hoisted output projection: one matmul + one bulk store -------------
    y_ref[...] = (jnp.dot(h_all[...], wout_ref[...],
                          preferred_element_type=jnp.float32) + bout_ref[...])


@jax.jit
def pose_lstm_forward(x, hidden, params):
    """x: (B, T, I) float32 (batch_first); hidden = (h0, c0), each (1, B, HID)."""
    B, T, I = x.shape
    h0 = hidden[0][0]                                   # (B, HID)
    c0 = hidden[1][0]                                   # (B, HID)

    # One-time weight fusion / pre-transposition (outside the kernel).
    #   gates = x @ (w_ih @ w_in).T + (w_ih @ b_in + b_ih + b_hh) + h @ w_hh.T
    w_fused = params["w_ih"] @ params["w_in"]                           # (4H, I)
    b_fused = params["w_ih"] @ params["b_in"] + params["b_ih"] + params["b_hh"]  # (4H,)

    wxg = jnp.transpose(w_fused.reshape(4, HID, I), (0, 2, 1))          # (4, I, H)
    bg = b_fused.reshape(4, 1, HID)                                     # (4, 1, H)
    whg = jnp.transpose(params["w_hh"].reshape(4, HID, HID), (0, 2, 1))  # (4, H, H)
    wout_t = params["w_out"].T                                          # (H, I)
    bout = params["b_out"].reshape(1, I)

    # time-major, flattened: row t*B + b is timestep t, batch element b
    x_flat = jnp.transpose(x, (1, 0, 2)).reshape(T * B, I)

    vmem = pl.BlockSpec(memory_space=pltpu.MemorySpace.VMEM)

    y_flat, h_n, c_n = pl.pallas_call(
        _pose_lstm_kernel,
        out_shape=(
            jax.ShapeDtypeStruct((T * B, I), jnp.float32),
            jax.ShapeDtypeStruct((B, HID), jnp.float32),
            jax.ShapeDtypeStruct((B, HID), jnp.float32),
        ),
        in_specs=[vmem] * 8,
        out_specs=(vmem, vmem, vmem),
        scratch_shapes=[pltpu.VMEM((T * B, HID), jnp.float32)],
    )(x_flat, h0, c0, wxg, bg, whg, wout_t, bout)

    y = jnp.transpose(y_flat.reshape(T, B, I), (1, 0, 2))       # back to (B, T, I)
    return y, (h_n[None], c_n[None])                            # hidden as (1, B, HID)

    # TODO(synk): for large B on v7x, add a leading "parallel" batch grid axis so
    # the two TensorCores each run an independent slice of the batch.


def pose_lstm_reference(x, hidden, params):
    """Pure-JAX reference (mirrors the PyTorch forward) for validation."""
    h0 = hidden[0][0]
    c0 = hidden[1][0]

    u = x @ params["w_in"].T + params["b_in"]                    # lstmin_linear

    def step(carry, xt):
        h, c = carry
        gates = xt @ params["w_ih"].T + params["b_ih"] + h @ params["w_hh"].T + params["b_hh"]
        i_g = jax.nn.sigmoid(gates[:, 0 * HID:1 * HID])
        f_g = jax.nn.sigmoid(gates[:, 1 * HID:2 * HID])
        g_g = jnp.tanh(gates[:, 2 * HID:3 * HID])
        o_g = jax.nn.sigmoid(gates[:, 3 * HID:4 * HID])
        c_new = f_g * c + i_g * g_g
        h_new = o_g * jnp.tanh(c_new)
        return (h_new, c_new), h_new

    (h_n, c_n), ys = jax.lax.scan(step, (h0, c0), jnp.transpose(u, (1, 0, 2)))
    ys = jnp.transpose(ys, (1, 0, 2))
    y = ys @ params["w_out"].T + params["b_out"]                 # lstmout_linear
    return y, (h_n[None], c_n[None])


def init_params(key, i_dim=I_DIM):
    ks = jax.random.split(key, 8)
    s = 0.1
    return {
        "w_in": jax.random.normal(ks[0], (10, i_dim), jnp.float32) * s,
        "b_in": jax.random.normal(ks[1], (10,), jnp.float32) * s,
        "w_ih": jax.random.normal(ks[2], (4 * HID, 10), jnp.float32) * s,
        "b_ih": jax.random.normal(ks[3], (4 * HID,), jnp.float32) * s,
        "w_hh": jax.random.normal(ks[4], (4 * HID, HID), jnp.float32) * s,
        "b_hh": jax.random.normal(ks[5], (4 * HID,), jnp.float32) * s,
        "w_out": jax.random.normal(ks[6], (i_dim, 10), jnp.float32) * s,
        "b_out": jax.random.normal(ks[7], (i_dim,), jnp.float32) * s,
    }


if __name__ == "__main__":
    key = jax.random.PRNGKey(0)
    k_p, k_x, k_h, k_c = jax.random.split(key, 4)

    B, T = 2, 8
    params = init_params(k_p)

    x = jax.random.normal(k_x, (B, T, I_DIM), jnp.float32)
    h0 = jax.random.normal(k_h, (1, B, HID), jnp.float32)
    c0 = jax.random.normal(k_c, (1, B, HID), jnp.float32)

    y, (h_n, c_n) = pose_lstm_forward(x, (h0, c0), params)
    jax.block_until_ready((y, h_n, c_n))

    y_ref, (h_ref, c_ref) = pose_lstm_reference(x, (h0, c0), params)
    assert y.shape == (B, T, I_DIM) and h_n.shape == (1, B, HID) and c_n.shape == (1, B, HID)
    assert jnp.allclose(y, y_ref, atol=1e-5), "output mismatch"
    assert jnp.allclose(h_n, h_ref, atol=1e-5), "h_n mismatch"
    assert jnp.allclose(c_n, c_ref, atol=1e-5), "c_n mismatch"

    print("KERNEL_OK")
</pallas_src>

<mosaic_0001>
module attributes {stable_mosaic.version = 11 : i64} {
  func.func @_pose_lstm_kernel(%arg0: memref<16x10xf32, #tpu.memory_space<vmem>>, %arg1: memref<2x10xf32, #tpu.memory_space<vmem>>, %arg2: memref<2x10xf32, #tpu.memory_space<vmem>>, %arg3: memref<4x10x10xf32, #tpu.memory_space<vmem>>, %arg4: memref<4x1x10xf32, #tpu.memory_space<vmem>>, %arg5: memref<4x10x10xf32, #tpu.memory_space<vmem>>, %arg6: memref<10x10xf32, #tpu.memory_space<vmem>>, %arg7: memref<1x10xf32, #tpu.memory_space<vmem>>, %arg8: memref<16x10xf32, #tpu.memory_space<vmem>>, %arg9: memref<2x10xf32, #tpu.memory_space<vmem>>, %arg10: memref<2x10xf32, #tpu.memory_space<vmem>>, %arg11: memref<16x10xf32, #tpu.memory_space<vmem>>) attributes {dimension_semantics = [], scalar_prefetch = 0 : i64, scratch_operands = 1 : i64, tpu.core_type = #tpu.core_type<tc>} {
    %c0 = arith.constant 0 : index
    %c0_0 = arith.constant 0 : index
    %0 = vector.load %arg0[%c0, %c0_0] : memref<16x10xf32, #tpu.memory_space<vmem>>, vector<16x10xf32>
    %c0_1 = arith.constant 0 : index
    %c0_2 = arith.constant 0 : index
    %c0_3 = arith.constant 0 : index
    %1 = vector.load %arg3[%c0_1, %c0_2, %c0_3] : memref<4x10x10xf32, #tpu.memory_space<vmem>>, vector<1x10x10xf32>
    %2 = vector.shape_cast %1 : vector<1x10x10xf32> to vector<10x10xf32>
    %cst = arith.constant dense<0.000000e+00> : vector<16x10xf32>
    %3 = tpu.matmul %0, %2, %cst {dimension_numbers = #tpu.dot_dimension_numbers<[1], [0], [0], [1], [0, 0, 1, 1], [], []>} : vector<16x10xf32>, vector<10x10xf32>, vector<16x10xf32> -> vector<16x10xf32>
    %c0_4 = arith.constant 0 : index
    %c0_5 = arith.constant 0 : index
    %c0_6 = arith.constant 0 : index
    %4 = vector.load %arg4[%c0_4, %c0_5, %c0_6] : memref<4x1x10xf32, #tpu.memory_space<vmem>>, vector<1x1x10xf32>
    %5 = vector.shape_cast %4 : vector<1x1x10xf32> to vector<1x10xf32>
    %6 = vector.broadcast %5 : vector<1x10xf32> to vector<16x10xf32>
    %7 = arith.addf %3, %6 : vector<16x10xf32>
    %c1 = arith.constant 1 : index
    %c0_7 = arith.constant 0 : index
    %c0_8 = arith.constant 0 : index
    %8 = vector.load %arg3[%c1, %c0_7, %c0_8] : memref<4x10x10xf32, #tpu.memory_space<vmem>>, vector<1x10x10xf32>
    %9 = vector.shape_cast %8 : vector<1x10x10xf32> to vector<10x10xf32>
    %cst_9 = arith.constant dense<0.000000e+00> : vector<16x10xf32>
    %10 = tpu.matmul %0, %9, %cst_9 {dimension_numbers = #tpu.dot_dimension_numbers<[1], [0], [0], [1], [0, 0, 1, 1], [], []>} : vector<16x10xf32>, vector<10x10xf32>, vector<16x10xf32> -> vector<16x10xf32>
    %c1_10 = arith.constant 1 : index
    %c0_11 = arith.constant 0 : index
    %c0_12 = arith.constant 0 : index
    %11 = vector.load %arg4[%c1_10, %c0_11, %c0_12] : memref<4x1x10xf32, #tpu.memory_space<vmem>>, vector<1x1x10xf32>
    %12 = vector.shape_cast %11 : vector<1x1x10xf32> to vector<1x10xf32>
    %13 = vector.broadcast %12 : vector<1x10xf32> to vector<16x10xf32>
    %14 = arith.addf %10, %13 : vector<16x10xf32>
    %c2 = arith.constant 2 : index
    %c0_13 = arith.constant 0 : index
    %c0_14 = arith.constant 0 : index
    %15 = vector.load %arg3[%c2, %c0_13, %c0_14] : memref<4x10x10xf32, #tpu.memory_space<vmem>>, vector<1x10x10xf32>
    %16 = vector.shape_cast %15 : vector<1x10x10xf32> to vector<10x10xf32>
    %cst_15 = arith.constant dense<0.000000e+00> : vector<16x10xf32>
    %17 = tpu.matmul %0, %16, %cst_15 {dimension_numbers = #tpu.dot_dimension_numbers<[1], [0], [0], [1], [0, 0, 1, 1], [], []>} : vector<16x10xf32>, vector<10x10xf32>, vector<16x10xf32> -> vector<16x10xf32>
    %c2_16 = arith.constant 2 : index
    %c0_17 = arith.constant 0 : index
    %c0_18 = arith.constant 0 : index
    %18 = vector.load %arg4[%c2_16, %c0_17, %c0_18] : memref<4x1x10xf32, #tpu.memory_space<vmem>>, vector<1x1x10xf32>
    %19 = vector.shape_cast %18 : vector<1x1x10xf32> to vector<1x10xf32>
    %20 = vector.broadcast %19 : vector<1x10xf32> to vector<16x10xf32>
    %21 = arith.addf %17, %20 : vector<16x10xf32>
    %c3 = arith.constant 3 : index
    %c0_19 = arith.constant 0 : index
    %c0_20 = arith.constant 0 : index
    %22 = vector.load %arg3[%c3, %c0_19, %c0_20] : memref<4x10x10xf32, #tpu.memory_space<vmem>>, vector<1x10x10xf32>
    %23 = vector.shape_cast %22 : vector<1x10x10xf32> to vector<10x10xf32>
    %cst_21 = arith.constant dense<0.000000e+00> : vector<16x10xf32>
    %24 = tpu.matmul %0, %23, %cst_21 {dimension_numbers = #tpu.dot_dimension_numbers<[1], [0], [0], [1], [0, 0, 1, 1], [], []>} : vector<16x10xf32>, vector<10x10xf32>, vector<16x10xf32> -> vector<16x10xf32>
    %c3_22 = arith.constant 3 : index
    %c0_23 = arith.constant 0 : index
    %c0_24 = arith.constant 0 : index
    %25 = vector.load %arg4[%c3_22, %c0_23, %c0_24] : memref<4x1x10xf32, #tpu.memory_space<vmem>>, vector<1x1x10xf32>
    %26 = vector.shape_cast %25 : vector<1x1x10xf32> to vector<1x10xf32>
    %27 = vector.broadcast %26 : vector<1x10xf32> to vector<16x10xf32>
    %28 = arith.addf %24, %27 : vector<16x10xf32>
    %c0_25 = arith.constant 0 : index
    %c0_26 = arith.constant 0 : index
    %c0_27 = arith.constant 0 : index
    %29 = vector.load %arg5[%c0_25, %c0_26, %c0_27] : memref<4x10x10xf32, #tpu.memory_space<vmem>>, vector<1x10x10xf32>
    %30 = vector.shape_cast %29 : vector<1x10x10xf32> to vector<10x10xf32>
    %c1_28 = arith.constant 1 : index
    %c0_29 = arith.constant 0 : index
    %c0_30 = arith.constant 0 : index
    %31 = vector.load %arg5[%c1_28, %c0_29, %c0_30] : memref<4x10x10xf32, #tpu.memory_space<vmem>>, vector<1x10x10xf32>
    %32 = vector.shape_cast %31 : vector<1x10x10xf32> to vector<10x10xf32>
    %c2_31 = arith.constant 2 : index
    %c0_32 = arith.constant 0 : index
    %c0_33 = arith.constant 0 : index
    %33 = vector.load %arg5[%c2_31, %c0_32, %c0_33] : memref<4x10x10xf32, #tpu.memory_space<vmem>>, vector<1x10x10xf32>
    %34 = vector.shape_cast %33 : vector<1x10x10xf32> to vector<10x10xf32>
    %c3_34 = arith.constant 3 : index
    %c0_35 = arith.constant 0 : index
    %c0_36 = arith.constant 0 : index
    %35 = vector.load %arg5[%c3_34, %c0_35, %c0_36] : memref<4x10x10xf32, #tpu.memory_space<vmem>>, vector<1x10x10xf32>
    %36 = vector.shape_cast %35 : vector<1x10x10xf32> to vector<10x10xf32>
    %c0_37 = arith.constant 0 : index
    %c0_38 = arith.constant 0 : index
    %37 = vector.load %arg1[%c0_37, %c0_38] : memref<2x10xf32, #tpu.memory_space<vmem>>, vector<2x10xf32>
    %c0_39 = arith.constant 0 : index
    %c0_40 = arith.constant 0 : index
    %38 = vector.load %arg2[%c0_39, %c0_40] : memref<2x10xf32, #tpu.memory_space<vmem>>, vector<2x10xf32>
    %39 = vector.extract_strided_slice %7 {offsets = [0, 0], sizes = [2, 10], strides = [1, 1]} : vector<16x10xf32> to vector<2x10xf32>
    %cst_41 = arith.constant dense<0.000000e+00> : vector<2x10xf32>
    %40 = tpu.matmul %37, %30, %cst_41 {dimension_numbers = #tpu.dot_dimension_numbers<[1], [0], [0], [1], [0, 0, 1, 1], [], []>} : vector<2x10xf32>, vector<10x10xf32>, vector<2x10xf32> -> vector<2x10xf32>
    %41 = arith.addf %39, %40 : vector<2x10xf32>
    %42 = vector.extract_strided_slice %14 {offsets = [0, 0], sizes = [2, 10], strides = [1, 1]} : vector<16x10xf32> to vector<2x10xf32>
    %cst_42 = arith.constant dense<0.000000e+00> : vector<2x10xf32>
    %43 = tpu.matmul %37, %32, %cst_42 {dimension_numbers = #tpu.dot_dimension_numbers<[1], [0], [0], [1], [0, 0, 1, 1], [], []>} : vector<2x10xf32>, vector<10x10xf32>, vector<2x10xf32> -> vector<2x10xf32>
    %44 = arith.addf %42, %43 : vector<2x10xf32>
    %45 = vector.extract_strided_slice %21 {offsets = [0, 0], sizes = [2, 10], strides = [1, 1]} : vector<16x10xf32> to vector<2x10xf32>
    %cst_43 = arith.constant dense<0.000000e+00> : vector<2x10xf32>
    %46 = tpu.matmul %37, %34, %cst_43 {dimension_numbers = #tpu.dot_dimension_numbers<[1], [0], [0], [1], [0, 0, 1, 1], [], []>} : vector<2x10xf32>, vector<10x10xf32>, vector<2x10xf32> -> vector<2x10xf32>
    %47 = arith.addf %45, %46 : vector<2x10xf32>
    %48 = vector.extract_strided_slice %28 {offsets = [0, 0], sizes = [2, 10], strides = [1, 1]} : vector<16x10xf32> to vector<2x10xf32>
    %cst_44 = arith.constant dense<0.000000e+00> : vector<2x10xf32>
    %49 = tpu.matmul %37, %36, %cst_44 {dimension_numbers = #tpu.dot_dimension_numbers<[1], [0], [0], [1], [0, 0, 1, 1], [], []>} : vector<2x10xf32>, vector<10x10xf32>, vector<2x10xf32> -> vector<2x10xf32>
    %50 = arith.addf %48, %49 : vector<2x10xf32>
    %51 = arith.negf %44 : vector<2x10xf32>
    %52 = math.exp %51 : vector<2x10xf32>
    %cst_45 = arith.constant 1.000000e+00 : f32
    %53 = vector.broadcast %cst_45 : f32 to vector<2x10xf32>
    %54 = arith.addf %53, %52 : vector<2x10xf32>
    %55 = arith.divf %53, %54 : vector<2x10xf32>
    %56 = arith.mulf %55, %38 : vector<2x10xf32>
    %57 = arith.negf %41 : vector<2x10xf32>
    %58 = math.exp %57 : vector<2x10xf32>
    %cst_46 = arith.constant 1.000000e+00 : f32
    %59 = vector.broadcast %cst_46 : f32 to vector<2x10xf32>
    %60 = arith.addf %59, %58 : vector<2x10xf32>
    %61 = arith.divf %59, %60 : vector<2x10xf32>
    %62 = math.tanh %47 : vector<2x10xf32>
    %63 = arith.mulf %61, %62 : vector<2x10xf32>
    %64 = arith.addf %56, %63 : vector<2x10xf32>
    %65 = arith.negf %50 : vector<2x10xf32>
    %66 = math.exp %65 : vector<2x10xf32>
    %cst_47 = arith.constant 1.000000e+00 : f32
    %67 = vector.broadcast %cst_47 : f32 to vector<2x10xf32>
    %68 = arith.addf %67, %66 : vector<2x10xf32>
    %69 = arith.divf %67, %68 : vector<2x10xf32>
    %70 = math.tanh %64 : vector<2x10xf32>
    %71 = arith.mulf %69, %70 : vector<2x10xf32>
    %c0_48 = arith.constant 0 : index
    %c0_49 = arith.constant 0 : index
    %72 = vector.load %arg11[%c0_48, %c0_49] : memref<16x10xf32, #tpu.memory_space<vmem>>, vector<2x10xf32>
    tpu.vector_store %arg11[%c0_48, %c0_49], %71 {strides = array<i32>} : memref<16x10xf32, #tpu.memory_space<vmem>>, vector<2x10xf32>,
    %73 = vector.extract_strided_slice %7 {offsets = [2, 0], sizes = [2, 10], strides = [1, 1]} : vector<16x10xf32> to vector<2x10xf32>
    %cst_50 = arith.constant dense<0.000000e+00> : vector<2x10xf32>
    %74 = tpu.matmul %71, %30, %cst_50 {dimension_numbers = #tpu.dot_dimension_numbers<[1], [0], [0], [1], [0, 0, 1, 1], [], []>} : vector<2x10xf32>, vector<10x10xf32>, vector<2x10xf32> -> vector<2x10xf32>
    %75 = arith.addf %73, %74 : vector<2x10xf32>
    %76 = vector.extract_strided_slice %14 {offsets = [2, 0], sizes = [2, 10], strides = [1, 1]} : vector<16x10xf32> to vector<2x10xf32>
    %cst_51 = arith.constant dense<0.000000e+00> : vector<2x10xf32>
    %77 = tpu.matmul %71, %32, %cst_51 {dimension_numbers = #tpu.dot_dimension_numbers<[1], [0], [0], [1], [0, 0, 1, 1], [], []>} : vector<2x10xf32>, vector<10x10xf32>, vector<2x10xf32> -> vector<2x10xf32>
    %78 = arith.addf %76, %77 : vector<2x10xf32>
    %79 = vector.extract_strided_slice %21 {offsets = [2, 0], sizes = [2, 10], strides = [1, 1]} : vector<16x10xf32> to vector<2x10xf32>
    %cst_52 = arith.constant dense<0.000000e+00> : vector<2x10xf32>
    %80 = tpu.matmul %71, %34, %cst_52 {dimension_numbers = #tpu.dot_dimension_numbers<[1], [0], [0], [1], [0, 0, 1, 1], [], []>} : vector<2x10xf32>, vector<10x10xf32>, vector<2x10xf32> -> vector<2x10xf32>
    %81 = arith.addf %79, %80 : vector<2x10xf32>
    %82 = vector.extract_strided_slice %28 {offsets = [2, 0], sizes = [2, 10], strides = [1, 1]} : vector<16x10xf32> to vector<2x10xf32>
    %cst_53 = arith.constant dense<0.000000e+00> : vector<2x10xf32>
    %83 = tpu.matmul %71, %36, %cst_53 {dimension_numbers = #tpu.dot_dimension_numbers<[1], [0], [0], [1], [0, 0, 1, 1], [], []>} : vector<2x10xf32>, vector<10x10xf32>, vector<2x10xf32> -> vector<2x10xf32>
    %84 = arith.addf %82, %83 : vector<2x10xf32>
    %85 = arith.negf %78 : vector<2x10xf32>
    %86 = math.exp %85 : vector<2x10xf32>
    %cst_54 = arith.constant 1.000000e+00 : f32
    %87 = vector.broadcast %cst_54 : f32 to vector<2x10xf32>
    %88 = arith.addf %87, %86 : vector<2x10xf32>
    %89 = arith.divf %87, %88 : vector<2x10xf32>
    %90 = arith.mulf %89, %64 : vector<2x10xf32>
    %91 = arith.negf %75 : vector<2x10xf32>
    %92 = math.exp %91 : vector<2x10xf32>
    %cst_55 = arith.constant 1.000000e+00 : f32
    %93 = vector.broadcast %cst_55 : f32 to vector<2x10xf32>
    %94 = arith.addf %93, %92 : vector<2x10xf32>
    %95 = arith.divf %93, %94 : vector<2x10xf32>
    %96 = math.tanh %81 : vector<2x10xf32>
    %97 = arith.mulf %95, %96 : vector<2x10xf32>
    %98 = arith.addf %90, %97 : vector<2x10xf32>
    %99 = arith.negf %84 : vector<2x10xf32>
    %100 = math.exp %99 : vector<2x10xf32>
    %cst_56 = arith.constant 1.000000e+00 : f32
    %101 = vector.broadcast %cst_56 : f32 to vector<2x10xf32>
    %102 = arith.addf %101, %100 : vector<2x10xf32>
    %103 = arith.divf %101, %102 : vector<2x10xf32>
    %104 = math.tanh %98 : vector<2x10xf32>
    %105 = arith.mulf %103, %104 : vector<2x10xf32>
    %c2_57 = arith.constant 2 : index
    %c0_58 = arith.constant 0 : index
    %106 = vector.load %arg11[%c2_57, %c0_58] : memref<16x10xf32, #tpu.memory_space<vmem>>, vector<2x10xf32>
    tpu.vector_store %arg11[%c2_57, %c0_58], %105 {strides = array<i32>} : memref<16x10xf32, #tpu.memory_space<vmem>>, vector<2x10xf32>,
    %107 = vector.extract_strided_slice %7 {offsets = [4, 0], sizes = [2, 10], strides = [1, 1]} : vector<16x10xf32> to vector<2x10xf32>
    %cst_59 = arith.constant dense<0.000000e+00> : vector<2x10xf32>
    %108 = tpu.matmul %105, %30, %cst_59 {dimension_numbers = #tpu.dot_dimension_numbers<[1], [0], [0], [1], [0, 0, 1, 1], [], []>} : vector<2x10xf32>, vector<10x10xf32>, vector<2x10xf32> -> vector<2x10xf32>
    %109 = arith.addf %107, %108 : vector<2x10xf32>
    %110 = vector.extract_strided_slice %14 {offsets = [4, 0], sizes = [2, 10], strides = [1, 1]} : vector<16x10xf32> to vector<2x10xf32>
    %cst_60 = arith.constant dense<0.000000e+00> : vector<2x10xf32>
    %111 = tpu.matmul %105, %32, %cst_60 {dimension_numbers = #tpu.dot_dimension_numbers<[1], [0], [0], [1], [0, 0, 1, 1], [], []>} : vector<2x10xf32>, vector<10x10xf32>, vector<2x10xf32> -> vector<2x10xf32>
    %112 = arith.addf %110, %111 : vector<2x10xf32>
    %113 = vector.extract_strided_slice %21 {offsets = [4, 0], sizes = [2, 10], strides = [1, 1]} : vector<16x10xf32> to vector<2x10xf32>
    %cst_61 = arith.constant dense<0.000000e+00> : vector<2x10xf32>
    %114 = tpu.matmul %105, %34, %cst_61 {dimension_numbers = #tpu.dot_dimension_numbers<[1], [0], [0], [1], [0, 0, 1, 1], [], []>} : vector<2x10xf32>, vector<10x10xf32>, vector<2x10xf32> -> vector<2x10xf32>
    %115 = arith.addf %113, %114 : vector<2x10xf32>
    %116 = vector.extract_strided_slice %28 {offsets = [4, 0], sizes = [2, 10], strides = [1, 1]} : vector<16x10xf32> to vector<2x10xf32>
    %cst_62 = arith.constant dense<0.000000e+00> : vector<2x10xf32>
    %117 = tpu.matmul %105, %36, %cst_62 {dimension_numbers = #tpu.dot_dimension_numbers<[1], [0], [0], [1], [0, 0, 1, 1], [], []>} : vector<2x10xf32>, vector<10x10xf32>, vector<2x10xf32> -> vector<2x10xf32>
    %118 = arith.addf %116, %117 : vector<2x10xf32>
    %119 = arith.negf %112 : vector<2x10xf32>
    %120 = math.exp %119 : vector<2x10xf32>
    %cst_63 = arith.constant 1.000000e+00 : f32
    %121 = vector.broadcast %cst_63 : f32 to vector<2x10xf32>
    %122 = arith.addf %121, %120 : vector<2x10xf32>
    %123 = arith.divf %121, %122 : vector<2x10xf32>
    %124 = arith.mulf %123, %98 : vector<2x10xf32>
    %125 = arith.negf %109 : vector<2x10xf32>
    %126 = math.exp %125 : vector<2x10xf32>
    %cst_64 = arith.constant 1.000000e+00 : f32
    %127 = vector.broadcast %cst_64 : f32 to vector<2x10xf32>
    %128 = arith.addf %127, %126 : vector<2x10xf32>
    %129 = arith.divf %127, %128 : vector<2x10xf32>
    %130 = math.tanh %115 : vector<2x10xf32>
    %131 = arith.mulf %129, %130 : vector<2x10xf32>
    %132 = arith.addf %124, %131 : vector<2x10xf32>
    %133 = arith.negf %118 : vector<2x10xf32>
    %134 = math.exp %133 : vector<2x10xf32>
    %cst_65 = arith.constant 1.000000e+00 : f32
    %135 = vector.broadcast %cst_65 : f32 to vector<2x10xf32>
    %136 = arith.addf %135, %134 : vector<2x10xf32>
    %137 = arith.divf %135, %136 : vector<2x10xf32>
    %138 = math.tanh %132 : vector<2x10xf32>
    %139 = arith.mulf %137, %138 : vector<2x10xf32>
    %c4 = arith.constant 4 : index
    %c0_66 = arith.constant 0 : index
    %140 = vector.load %arg11[%c4, %c0_66] : memref<16x10xf32, #tpu.memory_space<vmem>>, vector<2x10xf32>
    tpu.vector_store %arg11[%c4, %c0_66], %139 {strides = array<i32>} : memref<16x10xf32, #tpu.memory_space<vmem>>, vector<2x10xf32>,
    %141 = vector.extract_strided_slice %7 {offsets = [6, 0], sizes = [2, 10], strides = [1, 1]} : vector<16x10xf32> to vector<2x10xf32>
    %cst_67 = arith.constant dense<0.000000e+00> : vector<2x10xf32>
    %142 = tpu.matmul %139, %30, %cst_67 {dimension_numbers = #tpu.dot_dimension_numbers<[1], [0], [0], [1], [0, 0, 1, 1], [], []>} : vector<2x10xf32>, vector<10x10xf32>, vector<2x10xf32> -> vector<2x10xf32>
    %143 = arith.addf %141, %142 : vector<2x10xf32>
    %144 = vector.extract_strided_slice %14 {offsets = [6, 0], sizes = [2, 10], strides = [1, 1]} : vector<16x10xf32> to vector<2x10xf32>
    %cst_68 = arith.constant dense<0.000000e+00> : vector<2x10xf32>
    %145 = tpu.matmul %139, %32, %cst_68 {dimension_numbers = #tpu.dot_dimension_numbers<[1], [0], [0], [1], [0, 0, 1, 1], [], []>} : vector<2x10xf32>, vector<10x10xf32>, vector<2x10xf32> -> vector<2x10xf32>
    %146 = arith.addf %144, %145 : vector<2x10xf32>
    %147 = vector.extract_strided_slice %21 {offsets = [6, 0], sizes = [2, 10], strides = [1, 1]} : vector<16x10xf32> to vector<2x10xf32>
    %cst_69 = arith.constant dense<0.000000e+00> : vector<2x10xf32>
    %148 = tpu.matmul %139, %34, %cst_69 {dimension_numbers = #tpu.dot_dimension_numbers<[1], [0], [0], [1], [0, 0, 1, 1], [], []>} : vector<2x10xf32>, vector<10x10xf32>, vector<2x10xf32> -> vector<2x10xf32>
    %149 = arith.addf %147, %148 : vector<2x10xf32>
    %150 = vector.extract_strided_slice %28 {offsets = [6, 0], sizes = [2, 10], strides = [1, 1]} : vector<16x10xf32> to vector<2x10xf32>
    %cst_70 = arith.constant dense<0.000000e+00> : vector<2x10xf32>
    %151 = tpu.matmul %139, %36, %cst_70 {dimension_numbers = #tpu.dot_dimension_numbers<[1], [0], [0], [1], [0, 0, 1, 1], [], []>} : vector<2x10xf32>, vector<10x10xf32>, vector<2x10xf32> -> vector<2x10xf32>
    %152 = arith.addf %150, %151 : vector<2x10xf32>
    %153 = arith.negf %146 : vector<2x10xf32>
    %154 = math.exp %153 : vector<2x10xf32>
    %cst_71 = arith.constant 1.000000e+00 : f32
    %155 = vector.broadcast %cst_71 : f32 to vector<2x10xf32>
    %156 = arith.addf %155, %154 : vector<2x10xf32>
    %157 = arith.divf %155, %156 : vector<2x10xf32>
    %158 = arith.mulf %157, %132 : vector<2x10xf32>
    %159 = arith.negf %143 : vector<2x10xf32>
    %160 = math.exp %159 : vector<2x10xf32>
    %cst_72 = arith.constant 1.000000e+00 : f32
    %161 = vector.broadcast %cst_72 : f32 to vector<2x10xf32>
    %162 = arith.addf %161, %160 : vector<2x10xf32>
    %163 = arith.divf %161, %162 : vector<2x10xf32>
    %164 = math.tanh %149 : vector<2x10xf32>
    %165 = arith.mulf %163, %164 : vector<2x10xf32>
    %166 = arith.addf %158, %165 : vector<2x10xf32>
    %167 = arith.negf %152 : vector<2x10xf32>
    %168 = math.exp %167 : vector<2x10xf32>
    %cst_73 = arith.constant 1.000000e+00 : f32
    %169 = vector.broadcast %cst_73 : f32 to vector<2x10xf32>
    %170 = arith.addf %169, %168 : vector<2x10xf32>
    %171 = arith.divf %169, %170 : vector<2x10xf32>
    %172 = math.tanh %166 : vector<2x10xf32>
    %173 = arith.mulf %171, %172 : vector<2x10xf32>
    %c6 = arith.constant 6 : index
    %c0_74 = arith.constant 0 : index
    %174 = vector.load %arg11[%c6, %c0_74] : memref<16x10xf32, #tpu.memory_space<vmem>>, vector<2x10xf32>
    tpu.vector_store %arg11[%c6, %c0_74], %173 {strides = array<i32>} : memref<16x10xf32, #tpu.memory_space<vmem>>, vector<2x10xf32>,
    %175 = vector.extract_strided_slice %7 {offsets = [8, 0], sizes = [2, 10], strides = [1, 1]} : vector<16x10xf32> to vector<2x10xf32>
    %cst_75 = arith.constant dense<0.000000e+00> : vector<2x10xf32>
    %176 = tpu.matmul %173, %30, %cst_75 {dimension_numbers = #tpu.dot_dimension_numbers<[1], [0], [0], [1], [0, 0, 1, 1], [], []>} : vector<2x10xf32>, vector<10x10xf32>, vector<2x10xf32> -> vector<2x10xf32>
    %177 = arith.addf %175, %176 : vector<2x10xf32>
    %178 = vector.extract_strided_slice %14 {offsets = [8, 0], sizes = [2, 10], strides = [1, 1]} : vector<16x10xf32> to vector<2x10xf32>
    %cst_76 = arith.constant dense<0.000000e+00> : vector<2x10xf32>
    %179 = tpu.matmul %173, %32, %cst_76 {dimension_numbers = #tpu.dot_dimension_numbers<[1], [0], [0], [1], [0, 0, 1, 1], [], []>} : vector<2x10xf32>, vector<10x10xf32>, vector<2x10xf32> -> vector<2x10xf32>
    %180 = arith.addf %178, %179 : vector<2x10xf32>
    %181 = vector.extract_strided_slice %21 {offsets = [8, 0], sizes = [2, 10], strides = [1, 1]} : vector<16x10xf32> to vector<2x10xf32>
    %cst_77 = arith.constant dense<0.000000e+00> : vector<2x10xf32>
    %182 = tpu.matmul %173, %34, %cst_77 {dimension_numbers = #tpu.dot_dimension_numbers<[1], [0], [0], [1], [0, 0, 1, 1], [], []>} : vector<2x10xf32>, vector<10x10xf32>, vector<2x10xf32> -> vector<2x10xf32>
    %183 = arith.addf %181, %182 : vector<2x10xf32>
    %184 = vector.extract_strided_slice %28 {offsets = [8, 0], sizes = [2, 10], strides = [1, 1]} : vector<16x10xf32> to vector<2x10xf32>
    %cst_78 = arith.constant dense<0.000000e+00> : vector<2x10xf32>
    %185 = tpu.matmul %173, %36, %cst_78 {dimension_numbers = #tpu.dot_dimension_numbers<[1], [0], [0], [1], [0, 0, 1, 1], [], []>} : vector<2x10xf32>, vector<10x10xf32>, vector<2x10xf32> -> vector<2x10xf32>
    %186 = arith.addf %184, %185 : vector<2x10xf32>
    %187 = arith.negf %180 : vector<2x10xf32>
    %188 = math.exp %187 : vector<2x10xf32>
    %cst_79 = arith.constant 1.000000e+00 : f32
    %189 = vector.broadcast %cst_79 : f32 to vector<2x10xf32>
    %190 = arith.addf %189, %188 : vector<2x10xf32>
    %191 = arith.divf %189, %190 : vector<2x10xf32>
    %192 = arith.mulf %191, %166 : vector<2x10xf32>
    %193 = arith.negf %177 : vector<2x10xf32>
    %194 = math.exp %193 : vector<2x10xf32>
    %cst_80 = arith.constant 1.000000e+00 : f32
    %195 = vector.broadcast %cst_80 : f32 to vector<2x10xf32>
    %196 = arith.addf %195, %194 : vector<2x10xf32>
    %197 = arith.divf %195, %196 : vector<2x10xf32>
    %198 = math.tanh %183 : vector<2x10xf32>
    %199 = arith.mulf %197, %198 : vector<2x10xf32>
    %200 = arith.addf %192, %199 : vector<2x10xf32>
    %201 = arith.negf %186 : vector<2x10xf32>
    %202 = math.exp %201 : vector<2x10xf32>
    %cst_81 = arith.constant 1.000000e+00 : f32
    %203 = vector.broadcast %cst_81 : f32 to vector<2x10xf32>
    %204 = arith.addf %203, %202 : vector<2x10xf32>
    %205 = arith.divf %203, %204 : vector<2x10xf32>
    %206 = math.tanh %200 : vector<2x10xf32>
    %207 = arith.mulf %205, %206 : vector<2x10xf32>
    %c8 = arith.constant 8 : index
    %c0_82 = arith.constant 0 : index
    %208 = vector.load %arg11[%c8, %c0_82] : memref<16x10xf32, #tpu.memory_space<vmem>>, vector<2x10xf32>
    tpu.vector_store %arg11[%c8, %c0_82], %207 {strides = array<i32>} : memref<16x10xf32, #tpu.memory_space<vmem>>, vector<2x10xf32>,
    %209 = vector.extract_strided_slice %7 {offsets = [10, 0], sizes = [2, 10], strides = [1, 1]} : vector<16x10xf32> to vector<2x10xf32>
    %cst_83 = arith.constant dense<0.000000e+00> : vector<2x10xf32>
    %210 = tpu.matmul %207, %30, %cst_83 {dimension_numbers = #tpu.dot_dimension_numbers<[1], [0], [0], [1], [0, 0, 1, 1], [], []>} : vector<2x10xf32>, vector<10x10xf32>, vector<2x10xf32> -> vector<2x10xf32>
    %211 = arith.addf %209, %210 : vector<2x10xf32>
    %212 = vector.extract_strided_slice %14 {offsets = [10, 0], sizes = [2, 10], strides = [1, 1]} : vector<16x10xf32> to vector<2x10xf32>
    %cst_84 = arith.constant dense<0.000000e+00> : vector<2x10xf32>
    %213 = tpu.matmul %207, %32, %cst_84 {dimension_numbers = #tpu.dot_dimension_numbers<[1], [0], [0], [1], [0, 0, 1, 1], [], []>} : vector<2x10xf32>, vector<10x10xf32>, vector<2x10xf32> -> vector<2x10xf32>
    %214 = arith.addf %212, %213 : vector<2x10xf32>
    %215 = vector.extract_strided_slice %21 {offsets = [10, 0], sizes = [2, 10], strides = [1, 1]} : vector<16x10xf32> to vector<2x10xf32>
    %cst_85 = arith.constant dense<0.000000e+00> : vector<2x10xf32>
    %216 = tpu.matmul %207, %34, %cst_85 {dimension_numbers = #tpu.dot_dimension_numbers<[1], [0], [0], [1], [0, 0, 1, 1], [], []>} : vector<2x10xf32>, vector<10x10xf32>, vector<2x10xf32> -> vector<2x10xf32>
    %217 = arith.addf %215, %216 : vector<2x10xf32>
    %218 = vector.extract_strided_slice %28 {offsets = [10, 0], sizes = [2, 10], strides = [1, 1]} : vector<16x10xf32> to vector<2x10xf32>
    %cst_86 = arith.constant dense<0.000000e+00> : vector<2x10xf32>
    %219 = tpu.matmul %207, %36, %cst_86 {dimension_numbers = #tpu.dot_dimension_numbers<[1], [0], [0], [1], [0, 0, 1, 1], [], []>} : vector<2x10xf32>, vector<10x10xf32>, vector<2x10xf32> -> vector<2x10xf32>
    %220 = arith.addf %218, %219 : vector<2x10xf32>
    %221 = arith.negf %214 : vector<2x10xf32>
    %222 = math.exp %221 : vector<2x10xf32>
    %cst_87 = arith.constant 1.000000e+00 : f32
    %223 = vector.broadcast %cst_87 : f32 to vector<2x10xf32>
    %224 = arith.addf %223, %222 : vector<2x10xf32>
    %225 = arith.divf %223, %224 : vector<2x10xf32>
    %226 = arith.mulf %225, %200 : vector<2x10xf32>
    %227 = arith.negf %211 : vector<2x10xf32>
    %228 = math.exp %227 : vector<2x10xf32>
    %cst_88 = arith.constant 1.000000e+00 : f32
    %229 = vector.broadcast %cst_88 : f32 to vector<2x10xf32>
    %230 = arith.addf %229, %228 : vector<2x10xf32>
    %231 = arith.divf %229, %230 : vector<2x10xf32>
    %232 = math.tanh %217 : vector<2x10xf32>
    %233 = arith.mulf %231, %232 : vector<2x10xf32>
    %234 = arith.addf %226, %233 : vector<2x10xf32>
    %235 = arith.negf %220 : vector<2x10xf32>
    %236 = math.exp %235 : vector<2x10xf32>
    %cst_89 = arith.constant 1.000000e+00 : f32
    %237 = vector.broadcast %cst_89 : f32 to vector<2x10xf32>
    %238 = arith.addf %237, %236 : vector<2x10xf32>
    %239 = arith.divf %237, %238 : vector<2x10xf32>
    %240 = math.tanh %234 : vector<2x10xf32>
    %241 = arith.mulf %239, %240 : vector<2x10xf32>
    %c10 = arith.constant 10 : index
    %c0_90 = arith.constant 0 : index
    %242 = vector.load %arg11[%c10, %c0_90] : memref<16x10xf32, #tpu.memory_space<vmem>>, vector<2x10xf32>
    tpu.vector_store %arg11[%c10, %c0_90], %241 {strides = array<i32>} : memref<16x10xf32, #tpu.memory_space<vmem>>, vector<2x10xf32>,
    %243 = vector.extract_strided_slice %7 {offsets = [12, 0], sizes = [2, 10], strides = [1, 1]} : vector<16x10xf32> to vector<2x10xf32>
    %cst_91 = arith.constant dense<0.000000e+00> : vector<2x10xf32>
    %244 = tpu.matmul %241, %30, %cst_91 {dimension_numbers = #tpu.dot_dimension_numbers<[1], [0], [0], [1], [0, 0, 1, 1], [], []>} : vector<2x10xf32>, vector<10x10xf32>, vector<2x10xf32> -> vector<2x10xf32>
    %245 = arith.addf %243, %244 : vector<2x10xf32>
    %246 = vector.extract_strided_slice %14 {offsets = [12, 0], sizes = [2, 10], strides = [1, 1]} : vector<16x10xf32> to vector<2x10xf32>
    %cst_92 = arith.constant dense<0.000000e+00> : vector<2x10xf32>
    %247 = tpu.matmul %241, %32, %cst_92 {dimension_numbers = #tpu.dot_dimension_numbers<[1], [0], [0], [1], [0, 0, 1, 1], [], []>} : vector<2x10xf32>, vector<10x10xf32>, vector<2x10xf32> -> vector<2x10xf32>
    %248 = arith.addf %246, %247 : vector<2x10xf32>
    %249 = vector.extract_strided_slice %21 {offsets = [12, 0], sizes = [2, 10], strides = [1, 1]} : vector<16x10xf32> to vector<2x10xf32>
    %cst_93 = arith.constant dense<0.000000e+00> : vector<2x10xf32>
    %250 = tpu.matmul %241, %34, %cst_93 {dimension_numbers = #tpu.dot_dimension_numbers<[1], [0], [0], [1], [0, 0, 1, 1], [], []>} : vector<2x10xf32>, vector<10x10xf32>, vector<2x10xf32> -> vector<2x10xf32>
    %251 = arith.addf %249, %250 : vector<2x10xf32>
    %252 = vector.extract_strided_slice %28 {offsets = [12, 0], sizes = [2, 10], strides = [1, 1]} : vector<16x10xf32> to vector<2x10xf32>
    %cst_94 = arith.constant dense<0.000000e+00> : vector<2x10xf32>
    %253 = tpu.matmul %241, %36, %cst_94 {dimension_numbers = #tpu.dot_dimension_numbers<[1], [0], [0], [1], [0, 0, 1, 1], [], []>} : vector<2x10xf32>, vector<10x10xf32>, vector<2x10xf32> -> vector<2x10xf32>
    %254 = arith.addf %252, %253 : vector<2x10xf32>
    %255 = arith.negf %248 : vector<2x10xf32>
    %256 = math.exp %255 : vector<2x10xf32>
    %cst_95 = arith.constant 1.000000e+00 : f32
    %257 = vector.broadcast %cst_95 : f32 to vector<2x10xf32>
    %258 = arith.addf %257, %256 : vector<2x10xf32>
    %259 = arith.divf %257, %258 : vector<2x10xf32>
    %260 = arith.mulf %259, %234 : vector<2x10xf32>
    %261 = arith.negf %245 : vector<2x10xf32>
    %262 = math.exp %261 : vector<2x10xf32>
    %cst_96 = arith.constant 1.000000e+00 : f32
    %263 = vector.broadcast %cst_96 : f32 to vector<2x10xf32>
    %264 = arith.addf %263, %262 : vector<2x10xf32>
    %265 = arith.divf %263, %264 : vector<2x10xf32>
    %266 = math.tanh %251 : vector<2x10xf32>
    %267 = arith.mulf %265, %266 : vector<2x10xf32>
    %268 = arith.addf %260, %267 : vector<2x10xf32>
    %269 = arith.negf %254 : vector<2x10xf32>
    %270 = math.exp %269 : vector<2x10xf32>
    %cst_97 = arith.constant 1.000000e+00 : f32
    %271 = vector.broadcast %cst_97 : f32 to vector<2x10xf32>
    %272 = arith.addf %271, %270 : vector<2x10xf32>
    %273 = arith.divf %271, %272 : vector<2x10xf32>
    %274 = math.tanh %268 : vector<2x10xf32>
    %275 = arith.mulf %273, %274 : vector<2x10xf32>
    %c12 = arith.constant 12 : index
    %c0_98 = arith.constant 0 : index
    %276 = vector.load %arg11[%c12, %c0_98] : memref<16x10xf32, #tpu.memory_space<vmem>>, vector<2x10xf32>
    tpu.vector_store %arg11[%c12, %c0_98], %275 {strides = array<i32>} : memref<16x10xf32, #tpu.memory_space<vmem>>, vector<2x10xf32>,
    %277 = vector.extract_strided_slice %7 {offsets = [14, 0], sizes = [2, 10], strides = [1, 1]} : vector<16x10xf32> to vector<2x10xf32>
    %cst_99 = arith.constant dense<0.000000e+00> : vector<2x10xf32>
    %278 = tpu.matmul %275, %30, %cst_99 {dimension_numbers = #tpu.dot_dimension_numbers<[1], [0], [0], [1], [0, 0, 1, 1], [], []>} : vector<2x10xf32>, vector<10x10xf32>, vector<2x10xf32> -> vector<2x10xf32>
    %279 = arith.addf %277, %278 : vector<2x10xf32>
    %280 = vector.extract_strided_slice %14 {offsets = [14, 0], sizes = [2, 10], strides = [1, 1]} : vector<16x10xf32> to vector<2x10xf32>
    %cst_100 = arith.constant dense<0.000000e+00> : vector<2x10xf32>
    %281 = tpu.matmul %275, %32, %cst_100 {dimension_numbers = #tpu.dot_dimension_numbers<[1], [0], [0], [1], [0, 0, 1, 1], [], []>} : vector<2x10xf32>, vector<10x10xf32>, vector<2x10xf32> -> vector<2x10xf32>
    %282 = arith.addf %280, %281 : vector<2x10xf32>
    %283 = vector.extract_strided_slice %21 {offsets = [14, 0], sizes = [2, 10], strides = [1, 1]} : vector<16x10xf32> to vector<2x10xf32>
    %cst_101 = arith.constant dense<0.000000e+00> : vector<2x10xf32>
    %284 = tpu.matmul %275, %34, %cst_101 {dimension_numbers = #tpu.dot_dimension_numbers<[1], [0], [0], [1], [0, 0, 1, 1], [], []>} : vector<2x10xf32>, vector<10x10xf32>, vector<2x10xf32> -> vector<2x10xf32>
    %285 = arith.addf %283, %284 : vector<2x10xf32>
    %286 = vector.extract_strided_slice %28 {offsets = [14, 0], sizes = [2, 10], strides = [1, 1]} : vector<16x10xf32> to vector<2x10xf32>
    %cst_102 = arith.constant dense<0.000000e+00> : vector<2x10xf32>
    %287 = tpu.matmul %275, %36, %cst_102 {dimension_numbers = #tpu.dot_dimension_numbers<[1], [0], [0], [1], [0, 0, 1, 1], [], []>} : vector<2x10xf32>, vector<10x10xf32>, vector<2x10xf32> -> vector<2x10xf32>
    %288 = arith.addf %286, %287 : vector<2x10xf32>
    %289 = arith.negf %282 : vector<2x10xf32>
    %290 = math.exp %289 : vector<2x10xf32>
    %cst_103 = arith.constant 1.000000e+00 : f32
    %291 = vector.broadcast %cst_103 : f32 to vector<2x10xf32>
    %292 = arith.addf %291, %290 : vector<2x10xf32>
    %293 = arith.divf %291, %292 : vector<2x10xf32>
    %294 = arith.mulf %293, %268 : vector<2x10xf32>
    %295 = arith.negf %279 : vector<2x10xf32>
    %296 = math.exp %295 : vector<2x10xf32>
    %cst_104 = arith.constant 1.000000e+00 : f32
    %297 = vector.broadcast %cst_104 : f32 to vector<2x10xf32>
    %298 = arith.addf %297, %296 : vector<2x10xf32>
    %299 = arith.divf %297, %298 : vector<2x10xf32>
    %300 = math.tanh %285 : vector<2x10xf32>
    %301 = arith.mulf %299, %300 : vector<2x10xf32>
    %302 = arith.addf %294, %301 : vector<2x10xf32>
    %303 = arith.negf %288 : vector<2x10xf32>
    %304 = math.exp %303 : vector<2x10xf32>
    %cst_105 = arith.constant 1.000000e+00 : f32
    %305 = vector.broadcast %cst_105 : f32 to vector<2x10xf32>
    %306 = arith.addf %305, %304 : vector<2x10xf32>
    %307 = arith.divf %305, %306 : vector<2x10xf32>
    %308 = math.tanh %302 : vector<2x10xf32>
    %309 = arith.mulf %307, %308 : vector<2x10xf32>
    %c14 = arith.constant 14 : index
    %c0_106 = arith.constant 0 : index
    %310 = vector.load %arg11[%c14, %c0_106] : memref<16x10xf32, #tpu.memory_space<vmem>>, vector<2x10xf32>
    tpu.vector_store %arg11[%c14, %c0_106], %309 {strides = array<i32>} : memref<16x10xf32, #tpu.memory_space<vmem>>, vector<2x10xf32>,
    %c0_107 = arith.constant 0 : index
    %c0_108 = arith.constant 0 : index
    %311 = vector.load %arg9[%c0_107, %c0_108] : memref<2x10xf32, #tpu.memory_space<vmem>>, vector<2x10xf32>
    tpu.vector_store %arg9[%c0_107, %c0_108], %309 {strides = array<i32>} : memref<2x10xf32, #tpu.memory_space<vmem>>, vector<2x10xf32>,
    %c0_109 = arith.constant 0 : index
    %c0_110 = arith.constant 0 : index
    %312 = vector.load %arg10[%c0_109, %c0_110] : memref<2x10xf32, #tpu.memory_space<vmem>>, vector<2x10xf32>
    tpu.vector_store %arg10[%c0_109, %c0_110], %302 {strides = array<i32>} : memref<2x10xf32, #tpu.memory_space<vmem>>, vector<2x10xf32>,
    %c0_111 = arith.constant 0 : index
    %c0_112 = arith.constant 0 : index
    %313 = vector.load %arg11[%c0_111, %c0_112] : memref<16x10xf32, #tpu.memory_space<vmem>>, vector<16x10xf32>
    %c0_113 = arith.constant 0 : index
    %c0_114 = arith.constant 0 : index
    %314 = vector.load %arg6[%c0_113, %c0_114] : memref<10x10xf32, #tpu.memory_space<vmem>>, vector<10x10xf32>
    %cst_115 = arith.constant dense<0.000000e+00> : vector<16x10xf32>
    %315 = tpu.matmul %313, %314, %cst_115 {dimension_numbers = #tpu.dot_dimension_numbers<[1], [0], [0], [1], [0, 0, 1, 1], [], []>} : vector<16x10xf32>, vector<10x10xf32>, vector<16x10xf32> -> vector<16x10xf32>
    %c0_116 = arith.constant 0 : index
    %c0_117 = arith.constant 0 : index
    %316 = vector.load %arg7[%c0_116, %c0_117] : memref<1x10xf32, #tpu.memory_space<vmem>>, vector<1x10xf32>
    %317 = vector.broadcast %316 : vector<1x10xf32> to vector<16x10xf32>
    %318 = arith.addf %315, %317 : vector<16x10xf32>
    %c0_118 = arith.constant 0 : index
    %c0_119 = arith.constant 0 : index
    %319 = vector.load %arg8[%c0_118, %c0_119] : memref<16x10xf32, #tpu.memory_space<vmem>>, vector<16x10xf32>
    tpu.vector_store %arg8[%c0_118, %c0_119], %318 {strides = array<i32>} : memref<16x10xf32, #tpu.memory_space<vmem>>, vector<16x10xf32>,
    return
  }
}

</mosaic_0001>

<bundles_post_ra>
// kernel: pose_lstm_forward.1
= control target key start
LH: loop header
LB: loop body
LE: loop exit
PB: predicated region body
PF: predicated region fallthrough
CT: control target
= control target key end

     0   :  { %16 = vsyncpa [#allocation4], 0  ;;  %vm49_vm0 = vcmask 1041408   ;;  %vm42_vm1 = vcmask 80896   ;;  %s2317_s0 = inlined_call_operand.vmem [shape: f32[16,10], index: 0, kind: input, shape index: {}]   ;;  %s2318_s1 = inlined_call_operand.vmem [shape: f32[2,10], index: 1, kind: input, shape index: {}]   ;;  %s2319_s2 = inlined_call_operand.vmem [shape: f32[2,10], index: 2, kind: input, shape index: {}]   ;;  %s2320_s3 = inlined_call_operand.vmem [shape: f32[4,10,10], index: 3, kind: input, shape index: {}]   ;;  %s2321_s4 = inlined_call_operand.vmem [shape: f32[4,1,10], index: 4, kind: input, shape index: {}]   ;;  %s2322_s5 = inlined_call_operand.vmem [shape: f32[4,10,10], index: 5, kind: input, shape index: {}]   ;;  %s2323_s6 = inlined_call_operand.vmem [shape: f32[10,10], index: 6, kind: input, shape index: {}]   ;;  %s2324_s7 = inlined_call_operand.vmem [shape: f32[1,10], index: 7, kind: input, shape index: {}]   ;;  %s2325_s8 = inlined_call_operand.vmem [shape: f32[16,10], index: 8, kind: output, shape index: {0}]   ;;  %s2326_s9 = inlined_call_operand.hbm [shape: f32[2,10], index: 9, kind: output, shape index: {1}]   ;;  %s2327_s10 = inlined_call_operand.hbm [shape: f32[2,10], index: 10, kind: output, shape index: {2}]  }
   0x1   :  { %v37_v0 = vld [vmem:[%s2320_s3 + $0x8] sm:$0x3]  ;;  %v1609_v1 = vld [vmem:[%s2320_s3 + $0x38] sm:$0x3]  ;;  %v36_v2 = vld [vmem:[%s2320_s3] sm:$0xff] }
   0x2   :  { %1593 = vmatpush.msk.msra.mxu0 %vm49_vm0, %v37_v0  ;;  %1711 = vmatpush.msk.msra.mxu1 %vm49_vm0, %v37_v0  ;;  %v1608_v3 = vld [vmem:[%s2320_s3 + $0x30] sm:$0xff]  ;;  %v34_v4 = vld [vmem:[%s2317_s0] sm:$0xff]  ;;  %v35_v5 = vld [vmem:[%s2317_s0 + $0x8] sm:$0xff] }
   0x3   :  { %1611 = vmatpush.msk.msra.mxu3 %vm49_vm0, %v1609_v1  ;;  %v1597_v6 = vld [vmem:[%s2320_s3 + $0x18] sm:$0x3]  ;;  %v1603_v7 = vld [vmem:[%s2320_s3 + $0x28] sm:$0x3]  ;;  %v1596_v10 = vld [vmem:[%s2320_s3 + $0x10] sm:$0xff] }
   0x4   :  { %68 = vmatpush.msra.mxu0 %v36_v2  ;;  %1712 = vmatpush.msra.mxu1 %v36_v2  ;;  %v1993_v8 = vld [vmem:[%s2322_s5 + $0x8] sm:$0x3]  ;;  %v1998_v9 = vld [vmem:[%s2322_s5 + $0x38] sm:$0x3]  ;;  %v1602_v11 = vld [vmem:[%s2320_s3 + $0x20] sm:$0xff] }
   0x5   :  { %170 = vmatpush.msra.mxu3 %v1608_v3  ;;  %1594 = vmatmul.msk.f32.vlgmr.msra.gmra.mxu0 %vm42_vm1, %v34_v4  ;;  %v2011_v12 = vld [vmem:[%s2322_s5] sm:$0xff]  ;;  %v2018_v13 = vld [vmem:[%s2322_s5 + $0x18] sm:$0x3]  ;;  %v2023_v14 = vld [vmem:[%s2322_s5 + $0x30] sm:$0xff] }
   0x6   :  { %1595 = vmatmul.msk.f32.vlgmr.msra.gmra.mxu1 %vm42_vm1, %v35_v5  ;;  %1612 = vmatmul.msk.f32.vlgmr.msra.gmra.mxu3 %vm42_vm1, %v34_v4  ;;  %v2032_v15 = vld [vmem:[%s2322_s5 + $0x28] sm:$0x3] }
   0x7   :  { %1599 = vmatpush.msk.msrb.mxu1 %vm49_vm0, %v1597_v6  ;;  %1605 = vmatpush.msk.msra.mxu2 %vm49_vm0, %v1603_v7 }
   0x8   :  { %1620 = vmatpush.msk.msrb.mxu0 %vm49_vm0, %v1993_v8  ;;  %1626 = vmatpush.msk.msrb.mxu3 %vm49_vm0, %v1998_v9 }
   0x9   :  { %102 = vmatpush.msrb.mxu1 %v1596_v10  ;;  %136 = vmatpush.msra.mxu2 %v1602_v11 }
   0xa   :  { %17 = vsyncpa [#allocation6], 0  ;;  %1606 = vmatmul.msk.f32.vlgmr.msra.gmra.mxu2 %vm42_vm1, %v34_v4  ;;  %212 = vmatpush.msrb.mxu0 %v2011_v12  ;;  %v189_v16 = vld [vmem:[%s2318_s1] sm:$0x3]  ;;  %v2042_v17 = vld [vmem:[%s2322_s5 + $0x10] sm:$0xff]  ;;  %vm353_vm14 = vcmask 74752  }
   0xb   :  { %1622 = vmatpush.msk.msra.mxu1 %vm49_vm0, %v2018_v13  ;;  %284 = vmatpush.msrb.mxu3 %v2023_v14  ;;  %v2052_v18 = vld [vmem:[%s2322_s5 + $0x20] sm:$0xff]  ;;  %s1566_s0 = sshll.u32 %s2326_s9, 4  ;;  %s1906_s12 = smov [#allocation5]   ;;  %s1567_s0 = int_to_ptr.hbm [resolvable:$true] %s1566_s0 }
   0xc   :  { %1624 = vmatpush.msk.msrb.mxu2 %vm49_vm0, %v2032_v15  ;;  %1631 = vmatpush.msk.msra.mxu0 %vm49_vm0, %v1993_v8  ;;  %v1715_v19 = vld [vmem:[%s2321_s4] ss:$0 sm:$0xff]  ;;  %v1716_v30 = vld [vmem:[%s2321_s4 + $0x3] ss:$0 sm:$0xff]  ;;  %v1717_v32 = vld [vmem:[%s2321_s4 + $0x1] ss:$0 sm:$0xff] }
   0xd   :  { %1621 = vmatmul.msk.f32.vlgmr.msrb.gmra.mxu0 %vm42_vm1, %v189_v16  ;;  %236 = vmatpush.msra.mxu1 %v2042_v17  ;;  %v1718_v35 = vld [vmem:[%s2321_s4 + $0x2] ss:$0 sm:$0xff]  ;;  %s1575_s13 = sshll.u32 %s1906_s12, 4  ;;  %s1577_s15 = sshll.u32 %s2327_s10, 4  ;;  %s1576_s13 = int_to_ptr.vmem [resolvable:$true] %s1575_s13  ;;  %s1578_s15 = int_to_ptr.hbm [resolvable:$true] %s1577_s15 }
   0xe   :  { %1600 = vmatmul.msk.f32.vlgmr.msrb.gmra.mxu1 %vm42_vm1, %v34_v4  ;;  %1613 = vmatmul.msk.f32.gmra.mxu3 %vm42_vm1, %v35_v5 }
   0xf   :  { %260 = vmatpush.msrb.mxu2 %v2052_v18  ;;  %1633 = vmatpush.msk.msrb.mxu1 %vm49_vm0, %v2018_v13 }
  0x10   :  { %373 = vmatpush.msra.mxu0 %v2011_v12  ;;  %1637 = vmatpush.msk.msra.mxu3 %vm49_vm0, %v1998_v9 }
  0x11   :  { %1635 = vmatpush.msk.msra.mxu2 %vm49_vm0, %v2032_v15  ;;  %397 = vmatpush.msrb.mxu1 %v2042_v17 }
  0x12   :  { %1607 = vmatmul.msk.f32.gmra.mxu2 %vm42_vm1, %v35_v5  ;;  %1642 = vmatpush.msk.msrb.mxu0 %vm49_vm0, %v1993_v8 }
  0x13   :  { %421 = vmatpush.msra.mxu2 %v2052_v18  ;;  %445 = vmatpush.msra.mxu3 %v2023_v14 }
  0x14   :  { %541 = vmatpush.msrb.mxu0 %v2011_v12 }
  0x16   :  { %1601 = vmatmul.msk.f32.gmra.mxu1 %vm42_vm1, %v35_v5  ;;  %1627 = vmatmul.msk.f32.vlgmr.msrb.gmra.mxu3 %vm42_vm1, %v189_v16 }
  0x17   :  { %1648 = vmatpush.msk.msrb.mxu3 %vm49_vm0, %v1998_v9 }
  0x19   :  { %613 = vmatpush.msrb.mxu3 %v2023_v14 }
  0x1a   :  { %1625 = vmatmul.msk.f32.vlgmr.msrb.gmra.mxu2 %vm42_vm1, %v189_v16 }
  0x1b   :  { %1646 = vmatpush.msk.msrb.mxu2 %vm49_vm0, %v2032_v15 }
  0x1d   :  { %589 = vmatpush.msrb.mxu2 %v2052_v18 }
  0x1e   :  { %1623 = vmatmul.msk.f32.vlgmr.msra.gmra.mxu1 %vm42_vm1, %v189_v16 }
  0x1f   :  { %1644 = vmatpush.msk.msra.mxu1 %vm49_vm0, %v2018_v13 }
  0x21   :  { %565 = vmatpush.msra.mxu1 %v2042_v17 }
  0x82   :  { %v70_v20 = vpop.f32.mrf.mxu0 }
  0x83   :  { %v73_v21 = vpop.f32.mrf.mxu1  ;;  %v2093_v23 = vadd.f32 %v1715_v19, %v70_v20 }
  0x84   :  { %v2091_v22 = vadd.f32 %v1715_v19, %v73_v21  ;;  %v190_v21 = vld [vmem:[%s2319_s2] sm:$0x3] }
  0x89   :  { %v172_v24 = vpop.f32.mrf.mxu3 }
  0x8a   :  { %v214_v25 = vpop.f32.mrf.mxu0  ;;  %v2109_v39 = vadd.f32 %v1716_v30, %v172_v24 }
  0x8b   :  { %v104_v26 = vpop.f32.mrf.mxu1  ;;  %v217_v27 = vadd.f32 %v214_v25, %v2093_v23 }
  0x8c   :  { %v2113_v43 = vadd.f32 %v1717_v32, %v104_v26 }
  0x8d   :  { %v1629_v28 = vmul.f32 -1.442695, %v217_v27  ;;  %v138_v29 = vpop.f32.mrf.mxu2 }
  0x8e   :  { %v2117_v56 = vadd.f32 %v1718_v35, %v138_v29 }
  0x8f   :  { %1720 = vpow2.f32 %v1629_v28 }
  0x91   :  { %v175_v31 = vpop.f32.mrf.mxu3 }
  0x92   :  { %v2102_v33 = vadd.f32 %v1716_v30, %v175_v31 }
  0x93   :  { %v107_v34 = vpop.f32.mrf.mxu1 }
  0x94   :  { %v2107_v36 = vadd.f32 %v1717_v32, %v107_v34 }
  0x95   :  { %v1721_v37 = vpop.eup %1720  ;;  %v141_v38 = vpop.f32.mrf.mxu2 }
  0x96   :  { %v2111_v40 = vadd.f32 %v1718_v35, %v141_v38  ;;  %v313_v41 = vadd.f32 1.0, %v1721_v37 }
  0x98   :  { %1722 = vrcp.f32 %v313_v41  ;;  %vm319_vm2 = vweird.f32 %v313_v41  ;;  %v325_v1 = vand.u32 2147483648, %v313_v41  ;;  %v323_v3 = vand.u32 2147483647, %v313_v41 }
  0x99   :  { %v286_v42 = vpop.f32.mrf.mxu3 }
  0x9a   :  { %v289_v44 = vadd.f32 %v286_v42, %v2109_v39  ;;  %v326_v11 = vor.u32 1.1754944e-38, %v325_v1  ;;  %vm324_vm7 = vcmp.eq.f32.partialorder %v323_v3, 8.507059e+37 }
  0x9b   :  { %v238_v45 = vpop.f32.mrf.mxu1 }
  0x9c   :  { %v1630_v46 = vmul.f32 -1.442695, %v289_v44  ;;  %v241_v47 = vadd.f32 %v238_v45, %v2113_v43 }
  0x9d   :  { %v262_v57 = vpop.f32.mrf.mxu2 }
  0x9e   :  { %1724 = vpow2.f32 %v1630_v46  ;;  %v1628_v48 = vmul.f32 -1.442695, %v241_v47  ;;  %v1723_v49 = vpop.eup %1722  ;;  %v265_v59 = vadd.f32 %v262_v57, %v2117_v56 }
  0x9f   :  { %v315_v51 = vmul.f32 %v1723_v49, %v313_v41  ;;  %vm320_vm3 = vweird.f32 %v1723_v49 }
  0xa0   :  { %1726 = vpow2.f32 %v1628_v48  ;;  %vm321_vm4 = vmor %vm319_vm2, %vm320_vm3 }
  0xa1   :  { %v316_v55 = vsub.f32 1.0, %v315_v51 }
  0xa3   :  { %v317_v58 = vmul.f32 %v1723_v49, %v316_v55 }
  0xa4   :  { %v1725_v50 = vpop.eup %1724 }
  0xa5   :  { %v335_v52 = vadd.f32 1.0, %v1725_v50  ;;  %v318_v63 = vadd.f32 %v1723_v49, %v317_v58 }
  0xa6   :  { %v1727_v53 = vpop.eup %1726 }
  0xa7   :  { %v293_v54 = vadd.f32 1.0, %v1727_v53  ;;  %1728 = vrcp.f32 %v335_v52  ;;  %v322_v7 = vsel %vm321_vm4, %v1723_v49, %v318_v63  ;;  %v347_v32 = vand.u32 2147483648, %v335_v52 }
  0xa8   :  { %v327_v24 = vsel %vm324_vm7, %v326_v11, %v322_v7  ;;  %vm341_vm11 = vweird.f32 %v335_v52  ;;  %v345_v34 = vand.u32 2147483647, %v335_v52 }
  0xa9   :  { %1730 = vrcp.f32 %v293_v54  ;;  %v305_v4 = vand.u32 2147483648, %v293_v54  ;;  %v303_v6 = vand.u32 2147483647, %v293_v54  ;;  %vm299_vm6 = vweird.f32 %v293_v54 }
  0xaa   :  { %1732 = vtanh.f32 %v265_v59  ;;  %v348_v37 = vor.u32 1.1754944e-38, %v347_v32  ;;  %vm346_vm13 = vcmp.eq.f32.partialorder %v345_v34, 8.507059e+37 }
  0xab   :  { %v306_v20 = vor.u32 1.1754944e-38, %v305_v4  ;;  %vm304_vm9 = vcmp.eq.f32.partialorder %v303_v6, 8.507059e+37 }
  0xad   :  { %v1729_v60 = vpop.eup %1728 }
  0xae   :  { %v337_v0 = vmul.f32 %v1729_v60, %v335_v52  ;;  %vm342_vm10 = vweird.f32 %v1729_v60 }
  0xaf   :  { %v1731_v61 = vpop.eup %1730  ;;  %vm343_vm12 = vmor %vm341_vm11, %vm342_vm10 }
  0xb0   :  { %v295_v62 = vmul.f32 %v1731_v61, %v293_v54  ;;  %vm300_vm5 = vweird.f32 %v1731_v61  ;;  %v338_v10 = vsub.f32 1.0, %v337_v0  ;;  %v1733_v19 = vpop.eup %1732 }
  0xb1   :  { %vm301_vm8 = vmor %vm299_vm6, %vm300_vm5  ;;  %v330_v29 = vmul.f32 %v1733_v19, %v327_v24 }
  0xb2   :  { %v296_v2 = vsub.f32 1.0, %v295_v62  ;;  %v339_v26 = vmul.f32 %v1729_v60, %v338_v10 }
  0xb4   :  { %v297_v5 = vmul.f32 %v1731_v61, %v296_v2  ;;  %v340_v31 = vadd.f32 %v1729_v60, %v339_v26 }
  0xb6   :  { %v298_v16 = vadd.f32 %v1731_v61, %v297_v5  ;;  %v344_v35 = vsel %vm343_vm12, %v1729_v60, %v340_v31 }
  0xb7   :  { %v349_v41 = vsel %vm346_vm13, %v348_v37, %v344_v35  ;;  %vm520_vm13 = vcmask 76802  }
  0xb8   :  { %v302_v25 = vsel %vm301_vm8, %v1731_v61, %v298_v16 }
  0xb9   :  { %v307_v27 = vsel %vm304_vm9, %v306_v20, %v302_v25 }
  0xba   :  { %v309_v28 = vmul.f32 %v307_v27, %v190_v21 }
  0xbc   :  { %v2123_v30 = vadd.f32 %v330_v29, %v309_v28 }
  0xbe   :  { %1734 = vtanh.f32 %v2123_v30  ;;  %v474_v29 = vrot.slane %v2123_v30, 6 }
  0xc4   :  { %v1735_v38 = vpop.eup %1734 }
  0xc5   :  { %v352_v42 = vmul.f32 %v1735_v38, %v349_v41 }
  0xc7   :  { %354 = vst.msk [vmem:[#allocation2] sm:$0x3] %vm353_vm14, %v352_v42  ;;  %1632 = vmatmul.msk.f32.vlgmr.msra.gmra.mxu0 %vm42_vm1, %v352_v42  ;;  %1634 = vmatmul.msk.f32.vlgmr.msrb.gmra.mxu1 %vm42_vm1, %v352_v42 }
  0xc8   :  { %1636 = vmatmul.msk.f32.vlgmr.msra.gmra.mxu2 %vm42_vm1, %v352_v42  ;;  %1638 = vmatmul.msk.f32.vlgmr.msra.gmra.mxu3 %vm42_vm1, %v352_v42 }
  0xc9   :  { %1653 = vmatpush.msk.msra.mxu0 %vm49_vm0, %v1993_v8  ;;  %1655 = vmatpush.msk.msrb.mxu1 %vm49_vm0, %v2018_v13 }
  0xca   :  { %1657 = vmatpush.msk.msra.mxu2 %vm49_vm0, %v2032_v15  ;;  %1659 = vmatpush.msk.msra.mxu3 %vm49_vm0, %v1998_v9 }
  0xcb   :  { %709 = vmatpush.msra.mxu0 %v2011_v12  ;;  %733 = vmatpush.msrb.mxu1 %v2042_v17 }
  0xcc   :  { %757 = vmatpush.msra.mxu2 %v2052_v18  ;;  %781 = vmatpush.msra.mxu3 %v2023_v14 }
 0x144   :  { %v375_v44 = vpop.f32.mrf.mxu0  ;;  %v399_v45 = vpop.f32.mrf.mxu1 }
 0x145   :  { %v379_v46 = vrot.slane %v375_v44, 6  ;;  %v403_v47 = vrot.slane %v399_v45, 6 }
 0x147   :  { %v381_v48 = vadd.f32 %v379_v46, %v2093_v23  ;;  %v405_v49 = vadd.f32 %v403_v47, %v2113_v43 }
 0x149   :  { %v1640_v50 = vmul.f32 -1.442695, %v381_v48  ;;  %v1639_v51 = vmul.f32 -1.442695, %v405_v49 }
 0x14b   :  { %1736 = vpow2.f32 %v1640_v50  ;;  %v447_v52 = vpop.f32.mrf.mxu3  ;;  %v423_v61 = vpop.f32.mrf.mxu2 }
 0x14c   :  { %1738 = vpow2.f32 %v1639_v51  ;;  %v451_v53 = vrot.slane %v447_v52, 6  ;;  %v427_v62 = vrot.slane %v423_v61, 6 }
 0x14e   :  { %v453_v54 = vadd.f32 %v451_v53, %v2109_v39  ;;  %v429_v2 = vadd.f32 %v427_v62, %v2117_v56 }
 0x150   :  { %v1641_v55 = vmul.f32 -1.442695, %v453_v54 }
 0x151   :  { %v1737_v57 = vpop.eup %1736 }
 0x152   :  { %v1739_v58 = vpop.eup %1738  ;;  %v480_v59 = vadd.f32 1.0, %v1737_v57  ;;  %1740 = vpow2.f32 %v1641_v55 }
 0x153   :  { %v457_v60 = vadd.f32 1.0, %v1739_v58 }
 0x154   :  { %1742 = vrcp.f32 %v480_v59  ;;  %v492_v10 = vand.u32 2147483648, %v480_v59  ;;  %v490_v19 = vand.u32 2147483647, %v480_v59  ;;  %vm486_vm3 = vweird.f32 %v480_v59 }
 0x155   :  { %1744 = vrcp.f32 %v457_v60  ;;  %v469_v11 = vand.u32 2147483648, %v457_v60  ;;  %v467_v21 = vand.u32 2147483647, %v457_v60  ;;  %vm463_vm4 = vweird.f32 %v457_v60 }
 0x156   :  { %v493_v27 = vor.u32 1.1754944e-38, %v492_v10  ;;  %vm491_vm7 = vcmp.eq.f32.partialorder %v490_v19, 8.507059e+37 }
 0x157   :  { %v470_v31 = vor.u32 1.1754944e-38, %v469_v11  ;;  %vm468_vm8 = vcmp.eq.f32.partialorder %v467_v21, 8.507059e+37 }
 0x158   :  { %v1741_v63 = vpop.eup %1740 }
 0x159   :  { %v502_v0 = vadd.f32 1.0, %v1741_v63 }
 0x15a   :  { %v1743_v1 = vpop.eup %1742 }
 0x15b   :  { %v1745_v3 = vpop.eup %1744  ;;  %v482_v4 = vmul.f32 %v1743_v1, %v480_v59  ;;  %1746 = vrcp.f32 %v502_v0  ;;  %vm487_vm15 = vweird.f32 %v1743_v1  ;;  %v514_v30 = vand.u32 2147483648, %v502_v0 }
 0x15c   :  { %v459_v5 = vmul.f32 %v1745_v3, %v457_v60  ;;  %1748 = vtanh.f32 %v429_v2  ;;  %vm464_vm2 = vweird.f32 %v1745_v3  ;;  %vm488_vm5 = vmor %vm486_vm3, %vm487_vm15  ;;  %vm508_vm10 = vweird.f32 %v502_v0 }
 0x15d   :  { %v483_v6 = vsub.f32 1.0, %v482_v4  ;;  %vm465_vm6 = vmor %vm463_vm4, %vm464_vm2  ;;  %v512_v48 = vand.u32 2147483647, %v502_v0  ;;  %v515_v50 = vor.u32 1.1754944e-38, %v514_v30 }
 0x15e   :  { %v460_v7 = vsub.f32 1.0, %v459_v5 }
 0x15f   :  { %v484_v16 = vmul.f32 %v1743_v1, %v483_v6  ;;  %vm513_vm12 = vcmp.eq.f32.partialorder %v512_v48, 8.507059e+37 }
 0x160   :  { %v461_v20 = vmul.f32 %v1745_v3, %v460_v7 }
 0x161   :  { %v1747_v24 = vpop.eup %1746  ;;  %v485_v25 = vadd.f32 %v1743_v1, %v484_v16 }
 0x162   :  { %v462_v26 = vadd.f32 %v1745_v3, %v461_v20  ;;  %v504_v28 = vmul.f32 %v1747_v24, %v502_v0  ;;  %v1749_v34 = vpop.eup %1748  ;;  %vm509_vm9 = vweird.f32 %v1747_v24 }
 0x163   :  { %v489_v32 = vsel %vm488_vm5, %v1743_v1, %v485_v25  ;;  %vm510_vm11 = vmor %vm508_vm10, %vm509_vm9 }
 0x164   :  { %v466_v35 = vsel %vm465_vm6, %v1745_v3, %v462_v26  ;;  %v494_v37 = vsel %vm491_vm7, %v493_v27, %v489_v32  ;;  %v505_v38 = vsub.f32 1.0, %v504_v28 }
 0x165   :  { %v471_v41 = vsel %vm468_vm8, %v470_v31, %v466_v35  ;;  %v497_v42 = vmul.f32 %v1749_v34, %v494_v37 }
 0x166   :  { %v476_v44 = vmul.f32 %v474_v29, %v471_v41  ;;  %v506_v45 = vmul.f32 %v1747_v24, %v505_v38 }
 0x168   :  { %v2148_v46 = vadd.f32 %v497_v42, %v476_v44  ;;  %v507_v47 = vadd.f32 %v1747_v24, %v506_v45 }
 0x16a   :  { %1750 = vtanh.f32 %v2148_v46  ;;  %v511_v49 = vsel %vm510_vm11, %v1747_v24, %v507_v47  ;;  %v642_v47 = vrot.slane %v2148_v46, 6 }
 0x16b   :  { %v516_v52 = vsel %vm513_vm12, %v515_v50, %v511_v49 }
 0x170   :  { %v1751_v51 = vpop.eup %1750 }
 0x171   :  { %v519_v53 = vmul.f32 %v1751_v51, %v516_v52 }
 0x173   :  { %521 = vst.msk [vmem:[#allocation2] sm:$0xc] %vm520_vm13, %v519_v53  ;;  %v523_v54 = vrot.slane %v519_v53, 2 }
 0x175   :  { %1643 = vmatmul.msk.f32.vlgmr.msrb.gmra.mxu0 %vm42_vm1, %v523_v54  ;;  %1645 = vmatmul.msk.f32.vlgmr.msra.gmra.mxu1 %vm42_vm1, %v523_v54 }
 0x176   :  { %1647 = vmatmul.msk.f32.vlgmr.msrb.gmra.mxu2 %vm42_vm1, %v523_v54  ;;  %1649 = vmatmul.msk.f32.vlgmr.msrb.gmra.mxu3 %vm42_vm1, %v523_v54 }
 0x177   :  { %1664 = vmatpush.msk.msrb.mxu0 %vm49_vm0, %v1993_v8  ;;  %1666 = vmatpush.msk.msra.mxu1 %vm49_vm0, %v2018_v13 }
 0x178   :  { %1668 = vmatpush.msk.msrb.mxu2 %vm49_vm0, %v2032_v15  ;;  %1670 = vmatpush.msk.msrb.mxu3 %vm49_vm0, %v1998_v9 }
 0x179   :  { %877 = vmatpush.msrb.mxu0 %v2011_v12  ;;  %898 = vmatpush.msra.mxu1 %v2042_v17 }
 0x17a   :  { %919 = vmatpush.msrb.mxu2 %v2052_v18  ;;  %940 = vmatpush.msrb.mxu3 %v2023_v14 }
 0x1f2   :  { %v543_v55 = vpop.f32.mrf.mxu0  ;;  %v567_v57 = vpop.f32.mrf.mxu1 }
 0x1f3   :  { %v547_v58 = vrot.slane %v543_v55, 4  ;;  %v571_v59 = vrot.slane %v567_v57, 4 }
 0x1f5   :  { %v549_v60 = vadd.f32 %v547_v58, %v2093_v23  ;;  %v573_v61 = vadd.f32 %v571_v59, %v2113_v43 }
 0x1f7   :  { %v1651_v62 = vmul.f32 -1.442695, %v549_v60  ;;  %v1650_v63 = vmul.f32 -1.442695, %v573_v61 }
 0x1f9   :  { %1752 = vpow2.f32 %v1651_v62  ;;  %v615_v0 = vpop.f32.mrf.mxu3  ;;  %v591_v10 = vpop.f32.mrf.mxu2 }
 0x1fa   :  { %1754 = vpow2.f32 %v1650_v63  ;;  %v619_v1 = vrot.slane %v615_v0, 4  ;;  %v595_v11 = vrot.slane %v591_v10, 4 }
 0x1fc   :  { %v621_v2 = vadd.f32 %v619_v1, %v2109_v39  ;;  %v597_v21 = vadd.f32 %v595_v11, %v2117_v56 }
 0x1fe   :  { %v1652_v3 = vmul.f32 -1.442695, %v621_v2 }
 0x1ff   :  { %v1753_v4 = vpop.eup %1752 }
 0x200   :  { %v1755_v5 = vpop.eup %1754  ;;  %v648_v6 = vadd.f32 1.0, %v1753_v4  ;;  %1756 = vpow2.f32 %v1652_v3 }
 0x201   :  { %v625_v7 = vadd.f32 1.0, %v1755_v5 }
 0x202   :  { %1758 = vrcp.f32 %v648_v6  ;;  %v660_v29 = vand.u32 2147483648, %v648_v6  ;;  %v658_v34 = vand.u32 2147483647, %v648_v6  ;;  %vm654_vm3 = vweird.f32 %v648_v6 }
 0x203   :  { %1760 = vrcp.f32 %v625_v7  ;;  %v637_v31 = vand.u32 2147483648, %v625_v7  ;;  %v635_v37 = vand.u32 2147483647, %v625_v7  ;;  %vm631_vm4 = vweird.f32 %v625_v7 }
 0x204   :  { %v661_v44 = vor.u32 1.1754944e-38, %v660_v29  ;;  %vm659_vm7 = vcmp.eq.f32.partialorder %v658_v34, 8.507059e+37 }
 0x205   :  { %v638_v30 = vor.u32 1.1754944e-38, %v637_v31  ;;  %vm636_vm8 = vcmp.eq.f32.partialorder %v635_v37, 8.507059e+37 }
 0x206   :  { %v1757_v16 = vpop.eup %1756 }
 0x207   :  { %v670_v19 = vadd.f32 1.0, %v1757_v16 }
 0x208   :  { %v1759_v20 = vpop.eup %1758 }
 0x209   :  { %v1761_v24 = vpop.eup %1760  ;;  %v650_v25 = vmul.f32 %v1759_v20, %v648_v6  ;;  %1762 = vrcp.f32 %v670_v19  ;;  %vm655_vm15 = vweird.f32 %v1759_v20  ;;  %v682_v46 = vand.u32 2147483648, %v670_v19 }
 0x20a   :  { %v627_v26 = vmul.f32 %v1761_v24, %v625_v7  ;;  %1764 = vtanh.f32 %v597_v21  ;;  %vm632_vm2 = vweird.f32 %v1761_v24  ;;  %vm656_vm5 = vmor %vm654_vm3, %vm655_vm15  ;;  %vm676_vm10 = vweird.f32 %v670_v19 }
 0x20b   :  { %v651_v27 = vsub.f32 1.0, %v650_v25  ;;  %vm633_vm6 = vmor %vm631_vm4, %vm632_vm2  ;;  %v680_v60 = vand.u32 2147483647, %v670_v19  ;;  %v683_v62 = vor.u32 1.1754944e-38, %v682_v46  ;;  %vm688_vm15 = vcmask 78852  }
 0x20c   :  { %v628_v28 = vsub.f32 1.0, %v627_v26 }
 0x20d   :  { %v652_v32 = vmul.f32 %v1759_v20, %v651_v27  ;;  %vm681_vm12 = vcmp.eq.f32.partialorder %v680_v60, 8.507059e+37 }
 0x20e   :  { %v629_v35 = vmul.f32 %v1761_v24, %v628_v28 }
 0x20f   :  { %v1763_v38 = vpop.eup %1762  ;;  %v653_v41 = vadd.f32 %v1759_v20, %v652_v32 }
 0x210   :  { %v630_v42 = vadd.f32 %v1761_v24, %v629_v35  ;;  %v672_v45 = vmul.f32 %v1763_v38, %v670_v19  ;;  %v1765_v49 = vpop.eup %1764  ;;  %vm677_vm9 = vweird.f32 %v1763_v38 }
 0x211   :  { %v657_v48 = vsel %vm656_vm5, %v1759_v20, %v653_v41  ;;  %vm678_vm11 = vmor %vm676_vm10, %vm677_vm9 }
 0x212   :  { %v634_v50 = vsel %vm633_vm6, %v1761_v24, %v630_v42  ;;  %v662_v51 = vsel %vm659_vm7, %v661_v44, %v657_v48  ;;  %v673_v52 = vsub.f32 1.0, %v672_v45 }
 0x213   :  { %v639_v53 = vsel %vm636_vm8, %v638_v30, %v634_v50  ;;  %v665_v54 = vmul.f32 %v1765_v49, %v662_v51 }
 0x214   :  { %v644_v55 = vmul.f32 %v642_v47, %v639_v53  ;;  %v674_v57 = vmul.f32 %v1763_v38, %v673_v52 }
 0x216   :  { %v2173_v58 = vadd.f32 %v665_v54, %v644_v55  ;;  %v675_v59 = vadd.f32 %v1763_v38, %v674_v57 }
 0x218   :  { %1766 = vtanh.f32 %v2173_v58  ;;  %v679_v61 = vsel %vm678_vm11, %v1763_v38, %v675_v59  ;;  %v810_v53 = vrot.slane %v2173_v58, 6 }
 0x219   :  { %v684_v0 = vsel %vm681_vm12, %v683_v62, %v679_v61 }
 0x21e   :  { %v1767_v63 = vpop.eup %1766 }
 0x21f   :  { %v687_v1 = vmul.f32 %v1767_v63, %v684_v0 }
 0x221   :  { %689 = vst.msk [vmem:[#allocation2] sm:$0x30] %vm688_vm15, %v687_v1  ;;  %v691_v2 = vrot.slane %v687_v1, 4 }
 0x223   :  { %1654 = vmatmul.msk.f32.vlgmr.msra.gmra.mxu0 %vm42_vm1, %v691_v2  ;;  %1656 = vmatmul.msk.f32.vlgmr.msrb.gmra.mxu1 %vm42_vm1, %v691_v2 }
 0x224   :  { %1658 = vmatmul.msk.f32.vlgmr.msra.gmra.mxu2 %vm42_vm1, %v691_v2  ;;  %1660 = vmatmul.msk.f32.vlgmr.msra.gmra.mxu3 %vm42_vm1, %v691_v2 }
 0x225   :  { %1675 = vmatpush.msk.msra.mxu0 %vm49_vm0, %v1993_v8  ;;  %1677 = vmatpush.msk.msrb.mxu1 %vm49_vm0, %v2018_v13 }
 0x226   :  { %1679 = vmatpush.msk.msra.mxu2 %vm49_vm0, %v2032_v15  ;;  %1681 = vmatpush.msk.msra.mxu3 %vm49_vm0, %v1998_v9 }
 0x227   :  { %1031 = vmatpush.msra.mxu0 %v2011_v12  ;;  %1055 = vmatpush.msrb.mxu1 %v2042_v17 }
 0x228   :  { %1079 = vmatpush.msra.mxu2 %v2052_v18  ;;  %1103 = vmatpush.msra.mxu3 %v2023_v14 }
 0x2a0   :  { %v711_v3 = vpop.f32.mrf.mxu0  ;;  %v735_v4 = vpop.f32.mrf.mxu1 }
 0x2a1   :  { %v715_v5 = vrot.slane %v711_v3, 2  ;;  %v739_v6 = vrot.slane %v735_v4, 2 }
 0x2a3   :  { %v717_v7 = vadd.f32 %v715_v5, %v2093_v23  ;;  %v741_v10 = vadd.f32 %v739_v6, %v2113_v43 }
 0x2a5   :  { %v1662_v11 = vmul.f32 -1.442695, %v717_v7  ;;  %v1661_v16 = vmul.f32 -1.442695, %v741_v10 }
 0x2a7   :  { %1768 = vpow2.f32 %v1662_v11  ;;  %v783_v19 = vpop.f32.mrf.mxu3  ;;  %v759_v29 = vpop.f32.mrf.mxu2 }
 0x2a8   :  { %1770 = vpow2.f32 %v1661_v16  ;;  %v787_v20 = vrot.slane %v783_v19, 2  ;;  %v763_v23 = vrot.slane %v759_v29, 2 }
 0x2aa   :  { %v789_v21 = vadd.f32 %v787_v20, %v2109_v39  ;;  %v765_v34 = vadd.f32 %v763_v23, %v2117_v56 }
 0x2ac   :  { %v1663_v24 = vmul.f32 -1.442695, %v789_v21 }
 0x2ad   :  { %v1769_v25 = vpop.eup %1768 }
 0x2ae   :  { %v1771_v26 = vpop.eup %1770  ;;  %v816_v27 = vadd.f32 1.0, %v1769_v25  ;;  %1772 = vpow2.f32 %v1663_v24 }
 0x2af   :  { %v793_v28 = vadd.f32 1.0, %v1771_v26 }
 0x2b0   :  { %1774 = vrcp.f32 %v816_v27  ;;  %v828_v42 = vand.u32 2147483648, %v816_v27  ;;  %v826_v47 = vand.u32 2147483647, %v816_v27  ;;  %vm822_vm4 = vweird.f32 %v816_v27 }
 0x2b1   :  { %1776 = vrcp.f32 %v793_v28  ;;  %v805_v44 = vand.u32 2147483648, %v793_v28  ;;  %v803_v48 = vand.u32 2147483647, %v793_v28  ;;  %vm799_vm5 = vweird.f32 %v793_v28 }
 0x2b2   :  { %v829_v51 = vor.u32 1.1754944e-38, %v828_v42  ;;  %vm827_vm8 = vcmp.eq.f32.partialorder %v826_v47, 8.507059e+37 }
 0x2b3   :  { %v806_v54 = vor.u32 1.1754944e-38, %v805_v44  ;;  %vm804_vm9 = vcmp.eq.f32.partialorder %v803_v48, 8.507059e+37 }
 0x2b4   :  { %v1773_v31 = vpop.eup %1772 }
 0x2b5   :  { %v838_v43 = vadd.f32 1.0, %v1773_v31 }
 0x2b6   :  { %v1775_v32 = vpop.eup %1774 }
 0x2b7   :  { %v1777_v35 = vpop.eup %1776  ;;  %v818_v37 = vmul.f32 %v1775_v32, %v816_v27  ;;  %1778 = vrcp.f32 %v838_v43  ;;  %vm823_vm2 = vweird.f32 %v1775_v32  ;;  %v850_v58 = vand.u32 2147483648, %v838_v43 }
 0x2b8   :  { %v795_v38 = vmul.f32 %v1777_v35, %v793_v28  ;;  %1780 = vtanh.f32 %v765_v34  ;;  %vm800_vm3 = vweird.f32 %v1777_v35  ;;  %vm824_vm6 = vmor %vm822_vm4, %vm823_vm2  ;;  %vm844_vm11 = vweird.f32 %v838_v43 }
 0x2b9   :  { %v819_v39 = vsub.f32 1.0, %v818_v37  ;;  %vm801_vm7 = vmor %vm799_vm5, %vm800_vm3  ;;  %v848_v3 = vand.u32 2147483647, %v838_v43  ;;  %v851_v5 = vor.u32 1.1754944e-38, %v850_v58  ;;  %vm856_vm3 = vcmask 80902  }
 0x2ba   :  { %v796_v41 = vsub.f32 1.0, %v795_v38 }
 0x2bb   :  { %v820_v45 = vmul.f32 %v1775_v32, %v819_v39  ;;  %vm849_vm2 = vcmp.eq.f32.partialorder %v848_v3, 8.507059e+37 }
 0x2bc   :  { %v797_v30 = vmul.f32 %v1777_v35, %v796_v41 }
 0x2bd   :  { %v1779_v49 = vpop.eup %1778  ;;  %v821_v50 = vadd.f32 %v1775_v32, %v820_v45 }
 0x2be   :  { %v798_v56 = vadd.f32 %v1777_v35, %v797_v30  ;;  %v840_v52 = vmul.f32 %v1779_v49, %v838_v43  ;;  %v1781_v57 = vpop.eup %1780  ;;  %vm845_vm10 = vweird.f32 %v1779_v49 }
 0x2bf   :  { %v825_v55 = vsel %vm824_vm6, %v1775_v32, %v821_v50  ;;  %vm846_vm12 = vmor %vm844_vm11, %vm845_vm10 }
 0x2c0   :  { %v802_v59 = vsel %vm801_vm7, %v1777_v35, %v798_v56  ;;  %v830_v46 = vsel %vm827_vm8, %v829_v51, %v825_v55  ;;  %v841_v60 = vsub.f32 1.0, %v840_v52 }
 0x2c1   :  { %v807_v61 = vsel %vm804_vm9, %v806_v54, %v802_v59  ;;  %v833_v62 = vmul.f32 %v1781_v57, %v830_v46 }
 0x2c2   :  { %v812_v63 = vmul.f32 %v810_v53, %v807_v61  ;;  %v842_v0 = vmul.f32 %v1779_v49, %v841_v60 }
 0x2c4   :  { %v2198_v1 = vadd.f32 %v833_v62, %v812_v63  ;;  %v843_v2 = vadd.f32 %v1779_v49, %v842_v0 }
 0x2c6   :  { %1782 = vtanh.f32 %v2198_v1  ;;  %v847_v4 = vsel %vm846_vm12, %v1779_v49, %v843_v2  ;;  %v966_v52 = vrot.slane %v2198_v1, 6 }
 0x2c7   :  { %v852_v7 = vsel %vm849_vm2, %v851_v5, %v847_v4 }
 0x2cc   :  { %v1783_v6 = vpop.eup %1782 }
 0x2cd   :  { %v855_v10 = vmul.f32 %v1783_v6, %v852_v7  ;;  %v1848_v7 = vld [vmem:[%s2322_s5 + $0x8] sm:$0x3] }
 0x2cf   :  { %857 = vst.msk [vmem:[#allocation2] sm:$0xc0] %vm856_vm3, %v855_v10  ;;  %v859_v11 = vrot.slane %v855_v10, 6  ;;  %v1849_v10 = vld [vmem:[%s2322_s5 + $0x18] sm:$0x3] }
 0x2d1   :  { %1665 = vmatmul.msk.f32.vlgmr.msrb.gmra.mxu0 %vm42_vm1, %v859_v11  ;;  %1667 = vmatmul.msk.f32.vlgmr.msra.gmra.mxu1 %vm42_vm1, %v859_v11 }
 0x2d2   :  { %1669 = vmatmul.msk.f32.vlgmr.msrb.gmra.mxu2 %vm42_vm1, %v859_v11  ;;  %1671 = vmatmul.msk.f32.vlgmr.msrb.gmra.mxu3 %vm42_vm1, %v859_v11  ;;  %v1850_v11 = vld [vmem:[%s2322_s5 + $0x38] sm:$0x3] }
 0x2d3   :  { %1686 = vmatpush.msk.msrb.mxu0 %vm49_vm0, %v1993_v8  ;;  %1688 = vmatpush.msk.msra.mxu1 %vm49_vm0, %v2018_v13 }
 0x2d4   :  { %1690 = vmatpush.msk.msrb.mxu2 %vm49_vm0, %v2032_v15  ;;  %1692 = vmatpush.msk.msrb.mxu3 %vm49_vm0, %v1998_v9 }
 0x2d5   :  { %1198 = vmatpush.msrb.mxu0 %v2011_v12  ;;  %1222 = vmatpush.msra.mxu1 %v2042_v17 }
 0x2d6   :  { %1246 = vmatpush.msrb.mxu2 %v2052_v18  ;;  %1270 = vmatpush.msrb.mxu3 %v2023_v14 }
 0x34e   :  { %v879_v16 = vpop.f32.mrf.mxu0  ;;  %v900_v19 = vpop.f32.mrf.mxu1 }
 0x34f   :  { %v882_v8 = vadd.f32 %v879_v16, %v2091_v22  ;;  %v903_v13 = vadd.f32 %v900_v19, %v2107_v36  ;;  %v1851_v16 = vld [vmem:[%s2322_s5] sm:$0xff]  ;;  %v1852_v19 = vld [vmem:[%s2322_s5 + $0x30] sm:$0xff] }
 0x351   :  { %v1673_v20 = vmul.f32 -1.442695, %v882_v8  ;;  %v1672_v21 = vmul.f32 -1.442695, %v903_v13 }
 0x353   :  { %1784 = vpow2.f32 %v1673_v20 }
 0x354   :  { %1786 = vpow2.f32 %v1672_v21 }
 0x355   :  { %v942_v24 = vpop.f32.mrf.mxu3  ;;  %v921_v14 = vpop.f32.mrf.mxu2 }
 0x356   :  { %v945_v9 = vadd.f32 %v942_v24, %v2102_v33  ;;  %v924_v43 = vadd.f32 %v921_v14, %v2111_v40 }
 0x358   :  { %v1674_v12 = vmul.f32 -1.442695, %v945_v9 }
 0x359   :  { %v1785_v25 = vpop.eup %1784 }
 0x35a   :  { %v1787_v26 = vpop.eup %1786  ;;  %v972_v27 = vadd.f32 1.0, %v1785_v25  ;;  %1788 = vpow2.f32 %v1674_v12 }
 0x35b   :  { %v949_v28 = vadd.f32 1.0, %v1787_v26 }
 0x35c   :  { %1790 = vrcp.f32 %v972_v27  ;;  %v984_v39 = vand.u32 2147483648, %v972_v27  ;;  %v982_v44 = vand.u32 2147483647, %v972_v27  ;;  %vm978_vm6 = vweird.f32 %v972_v27 }
 0x35d   :  { %1792 = vrcp.f32 %v949_v28  ;;  %v961_v41 = vand.u32 2147483648, %v949_v28  ;;  %v959_v47 = vand.u32 2147483647, %v949_v28  ;;  %vm955_vm7 = vweird.f32 %v949_v28 }
 0x35e   :  { %v985_v50 = vor.u32 1.1754944e-38, %v984_v39  ;;  %vm983_vm10 = vcmp.eq.f32.partialorder %v982_v44, 8.507059e+37 }
 0x35f   :  { %v962_v51 = vor.u32 1.1754944e-38, %v961_v41  ;;  %vm960_vm11 = vcmp.eq.f32.partialorder %v959_v47, 8.507059e+37 }
 0x360   :  { %v1789_v29 = vpop.eup %1788 }
 0x361   :  { %v994_v23 = vadd.f32 1.0, %v1789_v29 }
 0x362   :  { %v1791_v31 = vpop.eup %1790 }
 0x363   :  { %v1793_v32 = vpop.eup %1792  ;;  %v974_v34 = vmul.f32 %v1791_v31, %v972_v27  ;;  %1794 = vrcp.f32 %v994_v23  ;;  %vm979_vm4 = vweird.f32 %v1791_v31  ;;  %v1006_v2 = vand.u32 2147483648, %v994_v23 }
 0x364   :  { %v951_v35 = vmul.f32 %v1793_v32, %v949_v28  ;;  %1796 = vtanh.f32 %v924_v43  ;;  %vm956_vm5 = vweird.f32 %v1793_v32  ;;  %vm980_vm8 = vmor %vm978_vm6, %vm979_vm4  ;;  %vm1000_vm2 = vweird.f32 %v994_v23 }
 0x365   :  { %v975_v37 = vsub.f32 1.0, %v974_v34  ;;  %vm957_vm9 = vmor %vm955_vm7, %vm956_vm5  ;;  %v1004_v1 = vand.u32 2147483647, %v994_v23  ;;  %v1007_v3 = vor.u32 1.1754944e-38, %v1006_v2 }
 0x366   :  { %v952_v38 = vsub.f32 1.0, %v951_v35 }
 0x367   :  { %v976_v42 = vmul.f32 %v1791_v31, %v975_v37  ;;  %vm1005_vm5 = vcmp.eq.f32.partialorder %v1004_v1, 8.507059e+37 }
 0x368   :  { %v953_v45 = vmul.f32 %v1793_v32, %v952_v38 }
 0x369   :  { %v1795_v30 = vpop.eup %1794  ;;  %v977_v48 = vadd.f32 %v1791_v31, %v976_v42 }
 0x36a   :  { %v954_v49 = vadd.f32 %v1793_v32, %v953_v45  ;;  %v996_v56 = vmul.f32 %v1795_v30, %v994_v23  ;;  %v1797_v54 = vpop.eup %1796  ;;  %vm1001_vm12 = vweird.f32 %v1795_v30 }
 0x36b   :  { %v981_v53 = vsel %vm980_vm8, %v1791_v31, %v977_v48  ;;  %vm1002_vm4 = vmor %vm1000_vm2, %vm1001_vm12 }
 0x36c   :  { %v958_v55 = vsel %vm957_vm9, %v1793_v32, %v954_v49  ;;  %v986_v57 = vsel %vm983_vm10, %v985_v50, %v981_v53  ;;  %v997_v59 = vsub.f32 1.0, %v996_v56 }
 0x36d   :  { %v963_v46 = vsel %vm960_vm11, %v962_v51, %v958_v55  ;;  %v989_v60 = vmul.f32 %v1797_v54, %v986_v57 }
 0x36e   :  { %v968_v61 = vmul.f32 %v966_v52, %v963_v46  ;;  %v998_v62 = vmul.f32 %v1795_v30, %v997_v59 }
 0x370   :  { %v2223_v63 = vadd.f32 %v989_v60, %v968_v61  ;;  %v999_v0 = vadd.f32 %v1795_v30, %v998_v62 }
 0x372   :  { %1798 = vtanh.f32 %v2223_v63  ;;  %v1003_v58 = vsel %vm1002_vm4, %v1795_v30, %v999_v0  ;;  %v1132_v54 = vrot.slane %v2223_v63, 6 }
 0x373   :  { %v1008_v5 = vsel %vm1005_vm5, %v1007_v3, %v1003_v58 }
 0x378   :  { %v1799_v4 = vpop.eup %1798 }
 0x379   :  { %v1011_v6 = vmul.f32 %v1799_v4, %v1008_v5 }
 0x37b   :  { %1012 = vst.msk [vmem:[#allocation2 + $0x8] sm:$0x3] %vm353_vm14, %v1011_v6  ;;  %1676 = vmatmul.msk.f32.vlgmr.msra.gmra.mxu0 %vm42_vm1, %v1011_v6  ;;  %1678 = vmatmul.msk.f32.vlgmr.msrb.gmra.mxu1 %vm42_vm1, %v1011_v6 }
 0x37c   :  { %1680 = vmatmul.msk.f32.vlgmr.msra.gmra.mxu2 %vm42_vm1, %v1011_v6  ;;  %1682 = vmatmul.msk.f32.vlgmr.msra.gmra.mxu3 %vm42_vm1, %v1011_v6 }
 0x37d   :  { %1697 = vmatpush.msk.msra.mxu0 %vm49_vm0, %v1848_v7  ;;  %1699 = vmatpush.msk.msrb.mxu1 %vm49_vm0, %v1849_v10 }
 0x37e   :  { %1701 = vmatpush.msk.msra.mxu2 %vm49_vm0, %v2032_v15  ;;  %1703 = vmatpush.msk.msra.mxu3 %vm49_vm0, %v1850_v11 }
 0x37f   :  { %1365 = vmatpush.msra.mxu0 %v1851_v16  ;;  %1389 = vmatpush.msrb.mxu1 %v2042_v17 }
 0x380   :  { %1413 = vmatpush.msra.mxu2 %v2052_v18  ;;  %1437 = vmatpush.msra.mxu3 %v1852_v19 }
 0x3f8   :  { %v1033_v15 = vpop.f32.mrf.mxu0  ;;  %v1057_v8 = vpop.f32.mrf.mxu1 }
 0x3f9   :  { %v1037_v13 = vrot.slane %v1033_v15, 6  ;;  %v1061_v20 = vrot.slane %v1057_v8, 6 }
 0x3fb   :  { %v1039_v21 = vadd.f32 %v1037_v13, %v2091_v22  ;;  %v1063_v24 = vadd.f32 %v1061_v20, %v2107_v36 }
 0x3fd   :  { %v1684_v9 = vmul.f32 -1.442695, %v1039_v21  ;;  %v1683_v12 = vmul.f32 -1.442695, %v1063_v24 }
 0x3ff   :  { %1800 = vpow2.f32 %v1684_v9  ;;  %v1105_v25 = vpop.f32.mrf.mxu3  ;;  %v1081_v23 = vpop.f32.mrf.mxu2 }
 0x400   :  { %1802 = vpow2.f32 %v1683_v12  ;;  %v1109_v17 = vrot.slane %v1105_v25, 6  ;;  %v1085_v31 = vrot.slane %v1081_v23, 6 }
 0x402   :  { %v1111_v18 = vadd.f32 %v1109_v17, %v2102_v33  ;;  %v1087_v35 = vadd.f32 %v1085_v31, %v2111_v40  ;;  %v1518_v31 = vld [vmem:[%s2323_s6 + $0x8] sm:$0x3] }
 0x404   :  { %v1685_v26 = vmul.f32 -1.442695, %v1111_v18 }
 0x405   :  { %v1801_v27 = vpop.eup %1800 }
 0x406   :  { %v1803_v28 = vpop.eup %1802  ;;  %v1138_v14 = vadd.f32 1.0, %v1801_v27  ;;  %1804 = vpow2.f32 %v1685_v26 }
 0x407   :  { %v1115_v29 = vadd.f32 1.0, %v1803_v28 }
 0x408   :  { %1806 = vrcp.f32 %v1138_v14  ;;  %v1150_v44 = vand.u32 2147483648, %v1138_v14  ;;  %v1148_v30 = vand.u32 2147483647, %v1138_v14  ;;  %vm1144_vm7 = vweird.f32 %v1138_v14 }
 0x409   :  { %1808 = vrcp.f32 %v1115_v29  ;;  %v1127_v45 = vand.u32 2147483648, %v1115_v29  ;;  %v1125_v49 = vand.u32 2147483647, %v1115_v29  ;;  %vm1121_vm8 = vweird.f32 %v1115_v29 }
 0x40a   :  { %v1151_v52 = vor.u32 1.1754944e-38, %v1150_v44  ;;  %vm1149_vm11 = vcmp.eq.f32.partialorder %v1148_v30, 8.507059e+37 }
 0x40b   :  { %v1128_v55 = vor.u32 1.1754944e-38, %v1127_v45  ;;  %vm1126_vm12 = vcmp.eq.f32.partialorder %v1125_v49, 8.507059e+37 }
 0x40c   :  { %v1805_v43 = vpop.eup %1804 }
 0x40d   :  { %v1160_v32 = vadd.f32 1.0, %v1805_v43  ;;  %v1517_v43 = vld [vmem:[%s2323_s6] sm:$0xff] }
 0x40e   :  { %v1807_v34 = vpop.eup %1806 }
 0x40f   :  { %v1809_v37 = vpop.eup %1808  ;;  %v1140_v38 = vmul.f32 %v1807_v34, %v1138_v14  ;;  %1810 = vrcp.f32 %v1160_v32  ;;  %vm1145_vm14 = vweird.f32 %v1807_v34  ;;  %v1172_v63 = vand.u32 2147483648, %v1160_v32 }
 0x410   :  { %v1117_v39 = vmul.f32 %v1809_v37, %v1115_v29  ;;  %1812 = vtanh.f32 %v1087_v35  ;;  %vm1122_vm6 = vweird.f32 %v1809_v37  ;;  %vm1146_vm9 = vmor %vm1144_vm7, %vm1145_vm14  ;;  %vm1166_vm4 = vweird.f32 %v1160_v32 }
 0x411   :  { %v1141_v41 = vsub.f32 1.0, %v1140_v38  ;;  %vm1123_vm10 = vmor %vm1121_vm8, %vm1122_vm6  ;;  %v1170_v4 = vand.u32 2147483647, %v1160_v32  ;;  %v1173_v6 = vor.u32 1.1754944e-38, %v1172_v63 }
 0x412   :  { %v1118_v42 = vsub.f32 1.0, %v1117_v39 }
 0x413   :  { %v1142_v47 = vmul.f32 %v1807_v34, %v1141_v41  ;;  %vm1171_vm14 = vcmp.eq.f32.partialorder %v1170_v4, 8.507059e+37 }
 0x414   :  { %v1119_v48 = vmul.f32 %v1809_v37, %v1118_v42 }
 0x415   :  { %v1811_v50 = vpop.eup %1810  ;;  %v1143_v56 = vadd.f32 %v1807_v34, %v1142_v47 }
 0x416   :  { %v1120_v51 = vadd.f32 %v1809_v37, %v1119_v48  ;;  %v1162_v53 = vmul.f32 %v1811_v50, %v1160_v32  ;;  %v1813_v59 = vpop.eup %1812  ;;  %vm1167_vm2 = vweird.f32 %v1811_v50 }
 0x417   :  { %v1147_v57 = vsel %vm1146_vm9, %v1807_v34, %v1143_v56  ;;  %vm1168_vm5 = vmor %vm1166_vm4, %vm1167_vm2 }
 0x418   :  { %v1124_v46 = vsel %vm1123_vm10, %v1809_v37, %v1120_v51  ;;  %v1152_v60 = vsel %vm1149_vm11, %v1151_v52, %v1147_v57  ;;  %v1163_v61 = vsub.f32 1.0, %v1162_v53 }
 0x419   :  { %v1129_v62 = vsel %vm1126_vm12, %v1128_v55, %v1124_v46  ;;  %v1155_v0 = vmul.f32 %v1813_v59, %v1152_v60 }
 0x41a   :  { %v1134_v2 = vmul.f32 %v1132_v54, %v1129_v62  ;;  %v1164_v1 = vmul.f32 %v1811_v50, %v1163_v61 }
 0x41c   :  { %v2258_v58 = vadd.f32 %v1155_v0, %v1134_v2  ;;  %v1165_v3 = vadd.f32 %v1811_v50, %v1164_v1 }
 0x41e   :  { %1814 = vtanh.f32 %v2258_v58  ;;  %v1169_v5 = vsel %vm1168_vm5, %v1811_v50, %v1165_v3  ;;  %v1299_v55 = vrot.slane %v2258_v58, 6 }
 0x41f   :  { %v1174_v10 = vsel %vm1171_vm14, %v1173_v6, %v1169_v5 }
 0x424   :  { %v1815_v7 = vpop.eup %1814 }
 0x425   :  { %v1177_v11 = vmul.f32 %v1815_v7, %v1174_v10 }
 0x427   :  { %1178 = vst.msk [vmem:[#allocation2 + $0x8] sm:$0xc] %vm520_vm13, %v1177_v11  ;;  %v1180_v16 = vrot.slane %v1177_v11, 2 }
 0x429   :  { %1687 = vmatmul.msk.f32.vlgmr.msrb.gmra.mxu0 %vm42_vm1, %v1180_v16  ;;  %1689 = vmatmul.msk.f32.vlgmr.msra.gmra.mxu1 %vm42_vm1, %v1180_v16 }
 0x42a   :  { %1691 = vmatmul.msk.f32.vlgmr.msrb.gmra.mxu2 %vm42_vm1, %v1180_v16  ;;  %1693 = vmatmul.msk.f32.vlgmr.msrb.gmra.mxu3 %vm42_vm1, %v1180_v16 }
 0x42b   :  { %1708 = vmatpush.msk.msrb.mxu0 %vm49_vm0, %v1518_v31 }
 0x42d   :  { %1547 = vmatpush.msrb.mxu0 %v1517_v43 }
 0x4a6   :  { %v1200_v19 = vpop.f32.mrf.mxu0  ;;  %v1224_v15 = vpop.f32.mrf.mxu1 }
 0x4a7   :  { %v1204_v8 = vrot.slane %v1200_v19, 4  ;;  %v1228_v13 = vrot.slane %v1224_v15, 4  ;;  %v1515_v15 = vld [vmem:[#allocation2] sm:$0xff] }
 0x4a9   :  { %v1206_v20 = vadd.f32 %v1204_v8, %v2091_v22  ;;  %v1230_v21 = vadd.f32 %v1228_v13, %v2107_v36 }
 0x4ab   :  { %v1695_v24 = vmul.f32 -1.442695, %v1206_v20  ;;  %v1694_v9 = vmul.f32 -1.442695, %v1230_v21 }
 0x4ad   :  { %1816 = vpow2.f32 %v1695_v24  ;;  %v1272_v12 = vpop.f32.mrf.mxu3  ;;  %v1248_v29 = vpop.f32.mrf.mxu2 }
 0x4ae   :  { %1818 = vpow2.f32 %v1694_v9  ;;  %v1276_v25 = vrot.slane %v1272_v12, 4  ;;  %v1252_v23 = vrot.slane %v1248_v29, 4 }
 0x4b0   :  { %v1278_v17 = vadd.f32 %v1276_v25, %v2102_v33  ;;  %v1254_v37 = vadd.f32 %v1252_v23, %v2111_v40 }
 0x4b2   :  { %v1696_v18 = vmul.f32 -1.442695, %v1278_v17  ;;  %v2292_v17 = vld [vmem:[%s2324_s7] ss:$0 sm:$0xff]  ;;  %s1905_s7 = smov [#allocation3]  }
 0x4b3   :  { %v1817_v26 = vpop.eup %1816  ;;  %s1564_s29 = sshll.u32 %s1905_s7, 4  ;;  %s1565_s29 = int_to_ptr.vmem [resolvable:$true] %s1564_s29 }
 0x4b4   :  { %v1819_v27 = vpop.eup %1818  ;;  %v1305_v28 = vadd.f32 1.0, %v1817_v26  ;;  %1820 = vpow2.f32 %v1696_v18 }
 0x4b5   :  { %v1282_v14 = vadd.f32 1.0, %v1819_v27 }
 0x4b6   :  { %1822 = vrcp.f32 %v1305_v28  ;;  %v1317_v45 = vand.u32 2147483648, %v1305_v28  ;;  %v1315_v48 = vand.u32 2147483647, %v1305_v28  ;;  %vm1311_vm6 = vweird.f32 %v1305_v28 }
 0x4b7   :  { %1824 = vrcp.f32 %v1282_v14  ;;  %v1294_v47 = vand.u32 2147483648, %v1282_v14  ;;  %v1292_v50 = vand.u32 2147483647, %v1282_v14  ;;  %vm1288_vm7 = vweird.f32 %v1282_v14 }
 0x4b8   :  { %v1318_v53 = vor.u32 1.1754944e-38, %v1317_v45  ;;  %vm1316_vm10 = vcmp.eq.f32.partialorder %v1315_v48, 8.507059e+37 }
 0x4b9   :  { %v1295_v57 = vor.u32 1.1754944e-38, %v1294_v47  ;;  %vm1293_vm11 = vcmp.eq.f32.partialorder %v1292_v50, 8.507059e+37 }
 0x4ba   :  { %v1821_v32 = vpop.eup %1820 }
 0x4bb   :  { %v1327_v34 = vadd.f32 1.0, %v1821_v32 }
 0x4bc   :  { %v1823_v35 = vpop.eup %1822 }
 0x4bd   :  { %v1825_v38 = vpop.eup %1824  ;;  %v1307_v39 = vmul.f32 %v1823_v35, %v1305_v28  ;;  %1826 = vrcp.f32 %v1327_v34  ;;  %vm1312_vm13 = vweird.f32 %v1823_v35  ;;  %v1339_v58 = vand.u32 2147483648, %v1327_v34 }
 0x4be   :  { %v1284_v41 = vmul.f32 %v1825_v38, %v1282_v14  ;;  %1828 = vtanh.f32 %v1254_v37  ;;  %vm1289_vm0 = vweird.f32 %v1825_v38  ;;  %vm1313_vm8 = vmor %vm1311_vm6, %vm1312_vm13  ;;  %vm1333_vm2 = vweird.f32 %v1327_v34 }
 0x4bf   :  { %v1308_v42 = vsub.f32 1.0, %v1307_v39  ;;  %vm1290_vm9 = vmor %vm1288_vm7, %vm1289_vm0  ;;  %v1337_v5 = vand.u32 2147483647, %v1327_v34  ;;  %v1340_v7 = vor.u32 1.1754944e-38, %v1339_v58 }
 0x4c0   :  { %v1285_v44 = vsub.f32 1.0, %v1284_v41 }
 0x4c1   :  { %v1309_v30 = vmul.f32 %v1823_v35, %v1308_v42  ;;  %vm1338_vm5 = vcmp.eq.f32.partialorder %v1337_v5, 8.507059e+37 }
 0x4c2   :  { %v1286_v49 = vmul.f32 %v1825_v38, %v1285_v44 }
 0x4c3   :  { %v1827_v56 = vpop.eup %1826  ;;  %v1310_v51 = vadd.f32 %v1823_v35, %v1309_v30 }
 0x4c4   :  { %v1287_v52 = vadd.f32 %v1825_v38, %v1286_v49  ;;  %v1329_v54 = vmul.f32 %v1827_v56, %v1327_v34  ;;  %v1829_v46 = vpop.eup %1828  ;;  %vm1334_vm12 = vweird.f32 %v1827_v56 }
 0x4c5   :  { %v1314_v59 = vsel %vm1313_vm8, %v1823_v35, %v1310_v51  ;;  %vm1335_vm4 = vmor %vm1333_vm2, %vm1334_vm12 }
 0x4c6   :  { %v1291_v60 = vsel %vm1290_vm9, %v1825_v38, %v1287_v52  ;;  %v1319_v61 = vsel %vm1316_vm10, %v1318_v53, %v1314_v59  ;;  %v1330_v62 = vsub.f32 1.0, %v1329_v54 }
 0x4c7   :  { %v1296_v0 = vsel %vm1293_vm11, %v1295_v57, %v1291_v60  ;;  %v1322_v2 = vmul.f32 %v1829_v46, %v1319_v61 }
 0x4c8   :  { %v1301_v1 = vmul.f32 %v1299_v55, %v1296_v0  ;;  %v1331_v3 = vmul.f32 %v1827_v56, %v1330_v62 }
 0x4ca   :  { %v2278_v63 = vadd.f32 %v1322_v2, %v1301_v1  ;;  %v1332_v4 = vadd.f32 %v1827_v56, %v1331_v3 }
 0x4cc   :  { %1830 = vtanh.f32 %v2278_v63  ;;  %v1336_v6 = vsel %vm1335_vm4, %v1827_v56, %v1332_v4  ;;  %v1466_v54 = vrot.slane %v2278_v63, 6 }
 0x4cd   :  { %v1341_v11 = vsel %vm1338_vm5, %v1340_v7, %v1336_v6 }
 0x4d2   :  { %v1831_v10 = vpop.eup %1830 }
 0x4d3   :  { %v1344_v16 = vmul.f32 %v1831_v10, %v1341_v11 }
 0x4d5   :  { %1345 = vst.msk [vmem:[#allocation2 + $0x8] sm:$0x30] %vm688_vm15, %v1344_v16  ;;  %v1347_v19 = vrot.slane %v1344_v16, 4 }
 0x4d7   :  { %1698 = vmatmul.msk.f32.vlgmr.msra.gmra.mxu0 %vm42_vm1, %v1347_v19  ;;  %1700 = vmatmul.msk.f32.vlgmr.msrb.gmra.mxu1 %vm42_vm1, %v1347_v19 }
 0x4d8   :  { %1702 = vmatmul.msk.f32.vlgmr.msra.gmra.mxu2 %vm42_vm1, %v1347_v19  ;;  %1704 = vmatmul.msk.f32.vlgmr.msra.gmra.mxu3 %vm42_vm1, %v1347_v19 }
 0x4df   :  { %1709 = vmatmul.msk.f32.vlgmr.msrb.gmra.mxu0 %vm42_vm1, %v1515_v15 }
 0x554   :  { %v1367_v8 = vpop.f32.mrf.mxu0  ;;  %v1391_v13 = vpop.f32.mrf.mxu1 }
 0x555   :  { %v1371_v20 = vrot.slane %v1367_v8, 2  ;;  %v1395_v21 = vrot.slane %v1391_v13, 2 }
 0x557   :  { %v1373_v24 = vadd.f32 %v1371_v20, %v2091_v22  ;;  %v1397_v9 = vadd.f32 %v1395_v21, %v2107_v36 }
 0x559   :  { %v1706_v12 = vmul.f32 -1.442695, %v1373_v24  ;;  %v1705_v25 = vmul.f32 -1.442695, %v1397_v9 }
 0x55b   :  { %1832 = vpow2.f32 %v1706_v12  ;;  %v1439_v18 = vpop.f32.mrf.mxu3  ;;  %v1415_v43 = vpop.f32.mrf.mxu2 }
 0x55c   :  { %1834 = vpow2.f32 %v1705_v25  ;;  %v1443_v26 = vrot.slane %v1439_v18, 2  ;;  %v1549_v27 = vpop.f32.mrf.mxu0  ;;  %v1419_v32 = vrot.slane %v1415_v43, 2 }
 0x55d   :  { %v1550_v28 = vadd.f32 %v2292_v17, %v1549_v27 }
 0x55e   :  { %v1445_v14 = vadd.f32 %v1443_v26, %v2102_v33  ;;  %v1421_v33 = vadd.f32 %v1419_v32, %v2111_v40 }
 0x55f   :  { %1555 = vst.msk [vmem:[%s2325_s8] sm:$0xff] %vm42_vm1, %v1550_v28 }
 0x560   :  { %v1707_v22 = vmul.f32 -1.442695, %v1445_v14 }
 0x561   :  { %v1833_v36 = vpop.eup %1832 }
 0x562   :  { %v1835_v29 = vpop.eup %1834  ;;  %v1472_v23 = vadd.f32 1.0, %v1833_v36  ;;  %1836 = vpow2.f32 %v1707_v22 }
 0x563   :  { %v1449_v31 = vadd.f32 1.0, %v1835_v29 }
 0x564   :  { %1838 = vrcp.f32 %v1472_v23  ;;  %v1484_v45 = vand.u32 2147483648, %v1472_v23  ;;  %v1482_v48 = vand.u32 2147483647, %v1472_v23  ;;  %vm1478_vm13 = vweird.f32 %v1472_v23 }
 0x565   :  { %1840 = vrcp.f32 %v1449_v31  ;;  %v1461_v47 = vand.u32 2147483648, %v1449_v31  ;;  %v1459_v50 = vand.u32 2147483647, %v1449_v31  ;;  %vm1455_vm0 = vweird.f32 %v1449_v31 }
 0x566   :  { %v1485_v52 = vor.u32 1.1754944e-38, %v1484_v45  ;;  %vm1483_vm8 = vcmp.eq.f32.partialorder %v1482_v48, 8.507059e+37 }
 0x567   :  { %v1462_v55 = vor.u32 1.1754944e-38, %v1461_v47  ;;  %vm1460_vm9 = vcmp.eq.f32.partialorder %v1459_v50, 8.507059e+37 }
 0x568   :  { %v1837_v34 = vpop.eup %1836 }
 0x569   :  { %v1494_v35 = vadd.f32 1.0, %v1837_v34 }
 0x56a   :  { %v1839_v37 = vpop.eup %1838 }
 0x56b   :  { %v1841_v38 = vpop.eup %1840  ;;  %v1474_v39 = vmul.f32 %v1839_v37, %v1472_v23  ;;  %1842 = vrcp.f32 %v1494_v35  ;;  %vm1479_vm15 = vweird.f32 %v1839_v37  ;;  %v1506_v63 = vand.u32 2147483648, %v1494_v35 }
 0x56c   :  { %v1451_v41 = vmul.f32 %v1841_v38, %v1449_v31  ;;  %1844 = vtanh.f32 %v1421_v33  ;;  %vm1456_vm14 = vweird.f32 %v1841_v38  ;;  %vm1480_vm6 = vmor %vm1478_vm13, %vm1479_vm15  ;;  %vm1500_vm11 = vweird.f32 %v1494_v35 }
 0x56d   :  { %v1475_v42 = vsub.f32 1.0, %v1474_v39  ;;  %vm1457_vm7 = vmor %vm1455_vm0, %vm1456_vm14  ;;  %v1504_v58 = vand.u32 2147483647, %v1494_v35  ;;  %v1507_v6 = vor.u32 1.1754944e-38, %v1506_v63 }
 0x56e   :  { %v1452_v44 = vsub.f32 1.0, %v1451_v41 }
 0x56f   :  { %v1476_v30 = vmul.f32 %v1839_v37, %v1475_v42  ;;  %vm1505_vm2 = vcmp.eq.f32.partialorder %v1504_v58, 8.507059e+37 }
 0x570   :  { %v1453_v49 = vmul.f32 %v1841_v38, %v1452_v44 }
 0x571   :  { %v1843_v56 = vpop.eup %1842  ;;  %v1477_v51 = vadd.f32 %v1839_v37, %v1476_v30 }
 0x572   :  { %v1454_v40 = vadd.f32 %v1841_v38, %v1453_v49  ;;  %v1496_v53 = vmul.f32 %v1843_v56, %v1494_v35  ;;  %v1845_v59 = vpop.eup %1844  ;;  %vm1501_vm10 = vweird.f32 %v1843_v56 }
 0x573   :  { %v1481_v57 = vsel %vm1480_vm6, %v1839_v37, %v1477_v51  ;;  %vm1502_vm12 = vmor %vm1500_vm11, %vm1501_vm10 }
 0x574   :  { %v1458_v46 = vsel %vm1457_vm7, %v1841_v38, %v1454_v40  ;;  %v1486_v60 = vsel %vm1483_vm8, %v1485_v52, %v1481_v57  ;;  %v1497_v61 = vsub.f32 1.0, %v1496_v53 }
 0x575   :  { %v1463_v62 = vsel %vm1460_vm9, %v1462_v55, %v1458_v46  ;;  %v1489_v0 = vmul.f32 %v1845_v59, %v1486_v60 }
 0x576   :  { %v1468_v2 = vmul.f32 %v1466_v54, %v1463_v62  ;;  %v1498_v1 = vmul.f32 %v1843_v56, %v1497_v61 }
 0x578   :  { %v1490_v3 = vadd.f32 %v1489_v0, %v1468_v2  ;;  %v1499_v4 = vadd.f32 %v1843_v56, %v1498_v1 }
 0x57a   :  { %1846 = vtanh.f32 %v1490_v3  ;;  %1514 = vst.msk [vmem:[#allocation5 - $0x6] sm:$0xc0] %vm856_vm3, %v1490_v3  ;;  %v1503_v5 = vsel %vm1502_vm12, %v1843_v56, %v1499_v4 }
 0x57b   :  { %v1508_v10 = vsel %vm1505_vm2, %v1507_v6, %v1503_v5  ;;  %1580 = dma.vmem_to_hbm [thread:$0]  %s1576_s13, 32, %s1578_s15, [#allocation6]  }
 0x580   :  { %v1847_v7 = vpop.eup %1846 }
 0x581   :  { %v1511_v11 = vmul.f32 %v1847_v7, %v1508_v10 }
 0x583   :  { %1512 = vst.msk [vmem:[#allocation2 + $0x8] sm:$0xc0] %vm856_vm3, %v1511_v11 }
 0x584   :  { %1513 = vst.msk [vmem:[#allocation3 - $0x6] sm:$0xc0] %vm856_vm3, %v1511_v11 }
 0x585   :  { %1569 = dma.vmem_to_hbm [thread:$0]  %s1565_s29, 32, %s1567_s0, [#allocation4]  }
 0x58a   :  { %v1516_v16 = vld [vmem:[#allocation2 + $0x8] sm:$0xff] }
 0x58b   :  { %1710 = vmatmul.msk.f32.gmra.mxu0 %vm42_vm1, %v1516_v16 }
 0x608   :  { %v1552_v19 = vpop.f32.mrf.mxu0 }
 0x609   :  { %v1553_v15 = vadd.f32 %v2292_v17, %v1552_v19 }
 0x60b   :  { %1556 = vst.msk [vmem:[%s2325_s8 + $0x8] sm:$0xff] %vm42_vm1, %v1553_v15 }
 0x60c   :  { %1901 = dma.done.wait [#allocation4], 32  }
 0x60d   :  { %1902 = vsyncadd [#allocation4], 4294967264 }
 0x60e   :  { %1903 = dma.done.wait [#allocation6], 32  }
 0x60f   :  { %1904 = vsyncadd [#allocation6], 4294967264 }
 0x610   :  { %1591 = vsyncpa [#allocation4], 1 }
 0x611   :  { %1592 = vsyncpa [#allocation6], 1 }

</bundles_post_ra>
